<compile_context>
chip_gen: v6e
topology: v6e:2x2x1
jax: 0.10.0
libtpu: 0.0.40
codegen_flags: <defaults>
</compile_context>

<pallas_src>
import functools

import jax
import jax.numpy as jnp
from jax import lax
from jax.experimental import pallas as pl
from jax.experimental.pallas import tpu as pltpu


# ----------------------------------------------------------------------------
# Shared LSTM cell math (whole-vreg activations: 2 EUP pushes + tanh(c))
# ----------------------------------------------------------------------------
def _lstm_cell(gates, c_prev, hidden):
    # At H=32, gates is (8, 128) == exactly one vreg, so full-vreg sigmoid /
    # tanh are the cheapest possible EUP form; the per-gate slices below are
    # the same slices the naive form needed anyway.
    sig = jax.nn.sigmoid(gates)
    th = jnp.tanh(gates)
    i = sig[:, 0 * hidden:1 * hidden]   # PyTorch gate order: i, f, g, o
    f = sig[:, 1 * hidden:2 * hidden]
    g = th[:, 2 * hidden:3 * hidden]
    o = sig[:, 3 * hidden:4 * hidden]
    c_new = f * c_prev + i * g
    h_new = o * jnp.tanh(c_new)
    return h_new, c_new


# ----------------------------------------------------------------------------
# Main kernel: fully-unrolled layer WAVEFRONT (small T), no VMEM scratch.
# Per-timestep tiles are (batch_pad, feat) with batch_pad == 8 (one sublane
# tile); timestep t of the layer-0 projection occupies rows
# [t*batch_pad, (t+1)*batch_pad) of gx0 (static, aligned slices).
# ----------------------------------------------------------------------------
def _wavefront_lstm_fc_kernel(num_layers, seq_len, batch_pad, hidden,
                              x_ref, *args):
    L, T, Bp, H = num_layers, seq_len, batch_pad, hidden
    layer_refs = args[:3 * L]
    w_fc_ref, b_fc_ref, out_ref = args[3 * L:]

    # Hoist all weight loads (loop-invariant).
    w_ih = [layer_refs[3 * l + 0][...] for l in range(L)]   # (D_in, 4H)
    w_hh = [layer_refs[3 * l + 1][...] for l in range(L)]   # (H, 4H)
    bias = [layer_refs[3 * l + 2][...] for l in range(L)]   # (1, 4H)

    # Off-critical-path hoisted layer-0 input projection for ALL timesteps:
    # one (T*Bp, D) @ (D, 4H) MXU matmul; result stays in vregs.
    gx0 = jnp.dot(x_ref[...], w_ih[0],
                  preferred_element_type=jnp.float32) + bias[0]

    zeros = jnp.zeros((Bp, H), jnp.float32)        # torch.zeros h_0 / c_0
    h = [zeros] * L
    c = [zeros] * L

    # Wavefront: step s advances layer l at timestep t = s - l.  Within a
    # step, every layer reads only values produced at step s-1 (snapshots),
    # so the L cell updates are mutually independent and can overlap.
    for s in range(T + L - 1):
        h_in = list(h)
        c_in = list(c)
        for l in range(L):
            t = s - l
            if not (0 <= t < T):
                continue
            hh = jnp.dot(h_in[l], w_hh[l], preferred_element_type=jnp.float32)
            if l == 0:
                gates = gx0[t * Bp:(t + 1) * Bp, :] + hh
            else:
                # Input projection folded into the per-step work for l >= 1:
                # same-size matmul as the W_hh one, independent chain.
                gates = (jnp.dot(h_in[l - 1], w_ih[l],
                                 preferred_element_type=jnp.float32)
                         + bias[l] + hh)
            h[l], c[l] = _lstm_cell(gates, c_in[l], H)

    # Final Linear on output[:, -1, :] of the last layer.  Lane/sublane-clean
    # (B_pad, O_pad) store; wrapper slices back to (B, O).
    out_ref[...] = (jnp.dot(h[L - 1], w_fc_ref[...],
                            preferred_element_type=jnp.float32)
                    + b_fc_ref[...])


# ----------------------------------------------------------------------------
# Fallback kernel for long sequences: layer-sequential, VMEM-scratch gate
# buffer + hidden sequence, rolled fori_loop (unroll=8).
# ----------------------------------------------------------------------------
def _layer_sequential_lstm_fc_kernel(num_layers, seq_len, batch_pad, hidden,
                                     x_ref, *args):
    layer_refs = args[:3 * num_layers]
    w_fc_ref, b_fc_ref, out_ref, gx_scr, seq_scr = args[3 * num_layers:]

    h_last = None
    for layer in range(num_layers):
        w_ih = layer_refs[3 * layer + 0][...]   # (D_in, 4H)
        w_hh = layer_refs[3 * layer + 1][...]   # (H, 4H)
        b = layer_refs[3 * layer + 2][...]      # (1, 4H)

        # Hoisted input projection for all timesteps of this layer.
        inp = x_ref[...] if layer == 0 else seq_scr[...]
        gx_scr[...] = (jnp.dot(inp, w_ih, preferred_element_type=jnp.float32)
                       + b)

        is_last = layer == num_layers - 1

        def step(t, carry, _w_hh=w_hh, _is_last=is_last):
            h_prev, c_prev = carry
            row = pl.multiple_of(t * batch_pad, batch_pad)
            gates = gx_scr[pl.ds(row, batch_pad), :] + jnp.dot(
                h_prev, _w_hh, preferred_element_type=jnp.float32)
            h_new, c_new = _lstm_cell(gates, c_prev, hidden)
            if not _is_last:  # next layer consumes the full hidden sequence
                seq_scr[pl.ds(row, batch_pad), :] = h_new
            return h_new, c_new

        h0 = jnp.zeros((batch_pad, hidden), jnp.float32)
        c0 = jnp.zeros((batch_pad, hidden), jnp.float32)
        h_last, _ = lax.fori_loop(0, seq_len, step, (h0, c0),
                                  unroll=min(8, seq_len))

    out_ref[...] = (jnp.dot(h_last, w_fc_ref[...],
                            preferred_element_type=jnp.float32)
                    + b_fc_ref[...])


# ----------------------------------------------------------------------------
# Wrapper
# ----------------------------------------------------------------------------
def lstm_model_forward(x_btd, params):
    """Full forward pass of LSTMModel. x_btd: (B, T, input_size)."""
    x = x_btd.astype(jnp.float32)
    B, T, D = x.shape
    num_layers = len(params["lstm"])
    H = params["lstm"][0][1].shape[1]          # w_hh: (4H, H)
    O = params["fc_w"].shape[0]
    B_pad = max(8, -(-B // 8) * 8)             # pad batch to a sublane tile
    O_pad = -(-O // 128) * 128                 # lane-friendly output width

    # (B, T, D) -> (T, B_pad, D) zero-padded -> flat (T*B_pad, D)
    x_p = jnp.zeros((T, B_pad, D), jnp.float32).at[:, :B, :].set(
        jnp.transpose(x, (1, 0, 2)))
    x_flat = x_p.reshape(T * B_pad, D)

    inputs = [x_flat]
    for (w_ih, w_hh, b_ih, b_hh) in params["lstm"]:
        inputs.append(jnp.transpose(w_ih))             # (D_in, 4H)
        inputs.append(jnp.transpose(w_hh))             # (H, 4H)
        inputs.append((b_ih + b_hh).reshape(1, -1))    # (1, 4H)
    fc_w = jnp.zeros((H, O_pad), jnp.float32).at[:, :O].set(
        jnp.transpose(params["fc_w"]))
    fc_b = jnp.zeros((1, O_pad), jnp.float32).at[:, :O].set(
        params["fc_b"].reshape(1, -1))
    inputs += [fc_w, fc_b]

    # gx0 kept in vregs only while it stays small (~half the vreg file).
    use_wavefront = (T * B_pad * 4 * H * 4) <= 128 * 1024 and T <= 32

    # Explicit VMEM budget for the single-invocation design (v7x: 64 MiB
    # physical / 32 MiB default scoped).
    gx_bytes = T * B_pad * 4 * H * 4
    seq_bytes = T * B_pad * H * 4
    out_bytes = B_pad * O_pad * 4
    data_bytes = (sum(int(a.size) * a.dtype.itemsize for a in inputs)
                  + out_bytes + gx_bytes + seq_bytes)
    vmem_limit = int(min(96 * 2**20, max(16 * 2**20, 2 * data_bytes)))
    cparams = pltpu.CompilerParams(vmem_limit_bytes=vmem_limit)

    if use_wavefront:
        kernel = functools.partial(
            _wavefront_lstm_fc_kernel, num_layers, T, B_pad, H)
        out = pl.pallas_call(
            kernel,
            out_shape=jax.ShapeDtypeStruct((B_pad, O_pad), jnp.float32),
            compiler_params=cparams,
        )(*inputs)
    else:
        # TODO(synk): a rolled steady-state wavefront (fori_loop over s with
        # gx0 in VMEM) would keep the latency win for long sequences too.
        kernel = functools.partial(
            _layer_sequential_lstm_fc_kernel, num_layers, T, B_pad, H)
        out = pl.pallas_call(
            kernel,
            out_shape=jax.ShapeDtypeStruct((B_pad, O_pad), jnp.float32),
            scratch_shapes=[
                pltpu.VMEM((T * B_pad, 4 * H), jnp.float32),  # gate buffer
                pltpu.VMEM((T * B_pad, H), jnp.float32),      # hidden sequence
            ],
            compiler_params=cparams,
        )(*inputs)

    return out[:B, :O]


# ----------------------------------------------------------------------------
# Deterministic parameter init (PyTorch-style U(-1/sqrt(H), 1/sqrt(H)))
# ----------------------------------------------------------------------------
def init_params(key, input_size, hidden_size, output_size, num_layers):
    k = 1.0 / jnp.sqrt(hidden_size)
    params = {"lstm": []}
    for layer in range(num_layers):
        in_dim = input_size if layer == 0 else hidden_size
        key, k1, k2, k3, k4 = jax.random.split(key, 5)
        w_ih = jax.random.uniform(k1, (4 * hidden_size, in_dim), jnp.float32, -k, k)
        w_hh = jax.random.uniform(k2, (4 * hidden_size, hidden_size), jnp.float32, -k, k)
        b_ih = jax.random.uniform(k3, (4 * hidden_size,), jnp.float32, -k, k)
        b_hh = jax.random.uniform(k4, (4 * hidden_size,), jnp.float32, -k, k)
        params["lstm"].append((w_ih, w_hh, b_ih, b_hh))
    key, k5, k6 = jax.random.split(key, 3)
    params["fc_w"] = jax.random.uniform(k5, (output_size, hidden_size), jnp.float32, -k, k)
    params["fc_b"] = jax.random.uniform(k6, (output_size,), jnp.float32, -k, k)
    return params


# ----------------------------------------------------------------------------
# Pure-JAX reference (sanity check)
# ----------------------------------------------------------------------------
def lstm_model_reference(x_btd, params):
    B = x_btd.shape[0]
    seq = x_btd.astype(jnp.float32)
    for (w_ih, w_hh, b_ih, b_hh) in params["lstm"]:
        H = w_hh.shape[1]
        h = jnp.zeros((B, H), jnp.float32)
        c = jnp.zeros((B, H), jnp.float32)
        outs = []
        for t in range(seq.shape[1]):
            gates = seq[:, t, :] @ w_ih.T + h @ w_hh.T + b_ih + b_hh
            i = jax.nn.sigmoid(gates[:, 0 * H:1 * H])
            f = jax.nn.sigmoid(gates[:, 1 * H:2 * H])
            g = jnp.tanh(gates[:, 2 * H:3 * H])
            o = jax.nn.sigmoid(gates[:, 3 * H:4 * H])
            c = f * c + i * g
            h = o * jnp.tanh(c)
            outs.append(h)
        seq = jnp.stack(outs, axis=1)
    return seq[:, -1, :] @ params["fc_w"].T + params["fc_b"]


# ----------------------------------------------------------------------------
if __name__ == "__main__":
    B, T = 2, 8
    input_size, hidden_size, output_size, num_layers = 16, 32, 8, 2

    key = jax.random.PRNGKey(0)
    key, xkey = jax.random.split(key)
    x = jax.random.normal(xkey, (B, T, input_size), jnp.float32)

    params = init_params(key, input_size, hidden_size, output_size, num_layers)

    fwd = jax.jit(lstm_model_forward)
    out = jax.block_until_ready(fwd(x, params))

    ref = lstm_model_reference(x, params)
    assert out.shape == (B, output_size)
    assert jnp.allclose(out, ref, atol=1e-5, rtol=1e-5), "mismatch vs reference"

    print("KERNEL_OK")
</pallas_src>

<mosaic_0001>
module attributes {stable_mosaic.version = 11 : i64} {
  func.func @_wavefront_lstm_fc_kernel(%arg0: memref<64x16xf32, #tpu.memory_space<vmem>>, %arg1: memref<16x128xf32, #tpu.memory_space<vmem>>, %arg2: memref<32x128xf32, #tpu.memory_space<vmem>>, %arg3: memref<1x128xf32, #tpu.memory_space<vmem>>, %arg4: memref<32x128xf32, #tpu.memory_space<vmem>>, %arg5: memref<32x128xf32, #tpu.memory_space<vmem>>, %arg6: memref<1x128xf32, #tpu.memory_space<vmem>>, %arg7: memref<32x128xf32, #tpu.memory_space<vmem>>, %arg8: memref<1x128xf32, #tpu.memory_space<vmem>>, %arg9: memref<8x128xf32, #tpu.memory_space<vmem>>) attributes {dimension_semantics = [], scalar_prefetch = 0 : i64, scratch_operands = 0 : i64, tpu.core_type = #tpu.core_type<tc>} {
    %c0 = arith.constant 0 : index
    %c0_0 = arith.constant 0 : index
    %0 = vector.load %arg1[%c0, %c0_0] : memref<16x128xf32, #tpu.memory_space<vmem>>, vector<16x128xf32>
    %c0_1 = arith.constant 0 : index
    %c0_2 = arith.constant 0 : index
    %1 = vector.load %arg4[%c0_1, %c0_2] : memref<32x128xf32, #tpu.memory_space<vmem>>, vector<32x128xf32>
    %c0_3 = arith.constant 0 : index
    %c0_4 = arith.constant 0 : index
    %2 = vector.load %arg2[%c0_3, %c0_4] : memref<32x128xf32, #tpu.memory_space<vmem>>, vector<32x128xf32>
    %c0_5 = arith.constant 0 : index
    %c0_6 = arith.constant 0 : index
    %3 = vector.load %arg5[%c0_5, %c0_6] : memref<32x128xf32, #tpu.memory_space<vmem>>, vector<32x128xf32>
    %c0_7 = arith.constant 0 : index
    %c0_8 = arith.constant 0 : index
    %4 = vector.load %arg3[%c0_7, %c0_8] : memref<1x128xf32, #tpu.memory_space<vmem>>, vector<1x128xf32>
    %c0_9 = arith.constant 0 : index
    %c0_10 = arith.constant 0 : index
    %5 = vector.load %arg6[%c0_9, %c0_10] : memref<1x128xf32, #tpu.memory_space<vmem>>, vector<1x128xf32>
    %c0_11 = arith.constant 0 : index
    %c0_12 = arith.constant 0 : index
    %6 = vector.load %arg0[%c0_11, %c0_12] : memref<64x16xf32, #tpu.memory_space<vmem>>, vector<64x16xf32>
    %cst = arith.constant dense<0.000000e+00> : vector<64x128xf32>
    %7 = tpu.matmul %6, %0, %cst {dimension_numbers = #tpu.dot_dimension_numbers<[1], [0], [0], [1], [0, 0, 1, 1], [], []>} : vector<64x16xf32>, vector<16x128xf32>, vector<64x128xf32> -> vector<64x128xf32>
    %8 = vector.broadcast %4 : vector<1x128xf32> to vector<64x128xf32>
    %9 = arith.addf %7, %8 : vector<64x128xf32>
    %cst_13 = arith.constant 0.000000e+00 : f32
    %10 = vector.broadcast %cst_13 : f32 to vector<8x32xf32>
    %cst_14 = arith.constant dense<0.000000e+00> : vector<8x128xf32>
    %11 = tpu.matmul %10, %2, %cst_14 {dimension_numbers = #tpu.dot_dimension_numbers<[1], [0], [0], [1], [0, 0, 1, 1], [], []>} : vector<8x32xf32>, vector<32x128xf32>, vector<8x128xf32> -> vector<8x128xf32>
    %12 = vector.extract_strided_slice %9 {offsets = [0, 0], sizes = [8, 128], strides = [1, 1]} : vector<64x128xf32> to vector<8x128xf32>
    %13 = arith.addf %12, %11 : vector<8x128xf32>
    %14 = arith.negf %13 : vector<8x128xf32>
    %15 = math.exp %14 : vector<8x128xf32>
    %cst_15 = arith.constant 1.000000e+00 : f32
    %16 = vector.broadcast %cst_15 : f32 to vector<8x128xf32>
    %17 = arith.addf %16, %15 : vector<8x128xf32>
    %18 = arith.divf %16, %17 : vector<8x128xf32>
    %19 = math.tanh %13 : vector<8x128xf32>
    %20 = vector.extract_strided_slice %18 {offsets = [0, 0], sizes = [8, 32], strides = [1, 1]} : vector<8x128xf32> to vector<8x32xf32>
    %21 = vector.extract_strided_slice %18 {offsets = [0, 32], sizes = [8, 32], strides = [1, 1]} : vector<8x128xf32> to vector<8x32xf32>
    %22 = vector.extract_strided_slice %19 {offsets = [0, 64], sizes = [8, 32], strides = [1, 1]} : vector<8x128xf32> to vector<8x32xf32>
    %23 = vector.extract_strided_slice %18 {offsets = [0, 96], sizes = [8, 32], strides = [1, 1]} : vector<8x128xf32> to vector<8x32xf32>
    %24 = arith.mulf %21, %10 : vector<8x32xf32>
    %25 = arith.mulf %20, %22 : vector<8x32xf32>
    %26 = arith.addf %24, %25 : vector<8x32xf32>
    %27 = math.tanh %26 : vector<8x32xf32>
    %28 = arith.mulf %23, %27 : vector<8x32xf32>
    %cst_16 = arith.constant dense<0.000000e+00> : vector<8x128xf32>
    %29 = tpu.matmul %28, %2, %cst_16 {dimension_numbers = #tpu.dot_dimension_numbers<[1], [0], [0], [1], [0, 0, 1, 1], [], []>} : vector<8x32xf32>, vector<32x128xf32>, vector<8x128xf32> -> vector<8x128xf32>
    %30 = vector.extract_strided_slice %9 {offsets = [8, 0], sizes = [8, 128], strides = [1, 1]} : vector<64x128xf32> to vector<8x128xf32>
    %31 = arith.addf %30, %29 : vector<8x128xf32>
    %32 = arith.negf %31 : vector<8x128xf32>
    %33 = math.exp %32 : vector<8x128xf32>
    %cst_17 = arith.constant 1.000000e+00 : f32
    %34 = vector.broadcast %cst_17 : f32 to vector<8x128xf32>
    %35 = arith.addf %34, %33 : vector<8x128xf32>
    %36 = arith.divf %34, %35 : vector<8x128xf32>
    %37 = math.tanh %31 : vector<8x128xf32>
    %38 = vector.extract_strided_slice %36 {offsets = [0, 0], sizes = [8, 32], strides = [1, 1]} : vector<8x128xf32> to vector<8x32xf32>
    %39 = vector.extract_strided_slice %36 {offsets = [0, 32], sizes = [8, 32], strides = [1, 1]} : vector<8x128xf32> to vector<8x32xf32>
    %40 = vector.extract_strided_slice %37 {offsets = [0, 64], sizes = [8, 32], strides = [1, 1]} : vector<8x128xf32> to vector<8x32xf32>
    %41 = vector.extract_strided_slice %36 {offsets = [0, 96], sizes = [8, 32], strides = [1, 1]} : vector<8x128xf32> to vector<8x32xf32>
    %42 = arith.mulf %39, %26 : vector<8x32xf32>
    %43 = arith.mulf %38, %40 : vector<8x32xf32>
    %44 = arith.addf %42, %43 : vector<8x32xf32>
    %45 = math.tanh %44 : vector<8x32xf32>
    %46 = arith.mulf %41, %45 : vector<8x32xf32>
    %cst_18 = arith.constant dense<0.000000e+00> : vector<8x128xf32>
    %47 = tpu.matmul %10, %3, %cst_18 {dimension_numbers = #tpu.dot_dimension_numbers<[1], [0], [0], [1], [0, 0, 1, 1], [], []>} : vector<8x32xf32>, vector<32x128xf32>, vector<8x128xf32> -> vector<8x128xf32>
    %cst_19 = arith.constant dense<0.000000e+00> : vector<8x128xf32>
    %48 = tpu.matmul %28, %1, %cst_19 {dimension_numbers = #tpu.dot_dimension_numbers<[1], [0], [0], [1], [0, 0, 1, 1], [], []>} : vector<8x32xf32>, vector<32x128xf32>, vector<8x128xf32> -> vector<8x128xf32>
    %49 = vector.broadcast %5 : vector<1x128xf32> to vector<8x128xf32>
    %50 = arith.addf %48, %49 : vector<8x128xf32>
    %51 = arith.addf %50, %47 : vector<8x128xf32>
    %52 = arith.negf %51 : vector<8x128xf32>
    %53 = math.exp %52 : vector<8x128xf32>
    %cst_20 = arith.constant 1.000000e+00 : f32
    %54 = vector.broadcast %cst_20 : f32 to vector<8x128xf32>
    %55 = arith.addf %54, %53 : vector<8x128xf32>
    %56 = arith.divf %54, %55 : vector<8x128xf32>
    %57 = math.tanh %51 : vector<8x128xf32>
    %58 = vector.extract_strided_slice %56 {offsets = [0, 0], sizes = [8, 32], strides = [1, 1]} : vector<8x128xf32> to vector<8x32xf32>
    %59 = vector.extract_strided_slice %56 {offsets = [0, 32], sizes = [8, 32], strides = [1, 1]} : vector<8x128xf32> to vector<8x32xf32>
    %60 = vector.extract_strided_slice %57 {offsets = [0, 64], sizes = [8, 32], strides = [1, 1]} : vector<8x128xf32> to vector<8x32xf32>
    %61 = vector.extract_strided_slice %56 {offsets = [0, 96], sizes = [8, 32], strides = [1, 1]} : vector<8x128xf32> to vector<8x32xf32>
    %62 = arith.mulf %59, %10 : vector<8x32xf32>
    %63 = arith.mulf %58, %60 : vector<8x32xf32>
    %64 = arith.addf %62, %63 : vector<8x32xf32>
    %65 = math.tanh %64 : vector<8x32xf32>
    %66 = arith.mulf %61, %65 : vector<8x32xf32>
    %cst_21 = arith.constant dense<0.000000e+00> : vector<8x128xf32>
    %67 = tpu.matmul %46, %2, %cst_21 {dimension_numbers = #tpu.dot_dimension_numbers<[1], [0], [0], [1], [0, 0, 1, 1], [], []>} : vector<8x32xf32>, vector<32x128xf32>, vector<8x128xf32> -> vector<8x128xf32>
    %68 = vector.extract_strided_slice %9 {offsets = [16, 0], sizes = [8, 128], strides = [1, 1]} : vector<64x128xf32> to vector<8x128xf32>
    %69 = arith.addf %68, %67 : vector<8x128xf32>
    %70 = arith.negf %69 : vector<8x128xf32>
    %71 = math.exp %70 : vector<8x128xf32>
    %cst_22 = arith.constant 1.000000e+00 : f32
    %72 = vector.broadcast %cst_22 : f32 to vector<8x128xf32>
    %73 = arith.addf %72, %71 : vector<8x128xf32>
    %74 = arith.divf %72, %73 : vector<8x128xf32>
    %75 = math.tanh %69 : vector<8x128xf32>
    %76 = vector.extract_strided_slice %74 {offsets = [0, 0], sizes = [8, 32], strides = [1, 1]} : vector<8x128xf32> to vector<8x32xf32>
    %77 = vector.extract_strided_slice %74 {offsets = [0, 32], sizes = [8, 32], strides = [1, 1]} : vector<8x128xf32> to vector<8x32xf32>
    %78 = vector.extract_strided_slice %75 {offsets = [0, 64], sizes = [8, 32], strides = [1, 1]} : vector<8x128xf32> to vector<8x32xf32>
    %79 = vector.extract_strided_slice %74 {offsets = [0, 96], sizes = [8, 32], strides = [1, 1]} : vector<8x128xf32> to vector<8x32xf32>
    %80 = arith.mulf %77, %44 : vector<8x32xf32>
    %81 = arith.mulf %76, %78 : vector<8x32xf32>
    %82 = arith.addf %80, %81 : vector<8x32xf32>
    %83 = math.tanh %82 : vector<8x32xf32>
    %84 = arith.mulf %79, %83 : vector<8x32xf32>
    %cst_23 = arith.constant dense<0.000000e+00> : vector<8x128xf32>
    %85 = tpu.matmul %66, %3, %cst_23 {dimension_numbers = #tpu.dot_dimension_numbers<[1], [0], [0], [1], [0, 0, 1, 1], [], []>} : vector<8x32xf32>, vector<32x128xf32>, vector<8x128xf32> -> vector<8x128xf32>
    %cst_24 = arith.constant dense<0.000000e+00> : vector<8x128xf32>
    %86 = tpu.matmul %46, %1, %cst_24 {dimension_numbers = #tpu.dot_dimension_numbers<[1], [0], [0], [1], [0, 0, 1, 1], [], []>} : vector<8x32xf32>, vector<32x128xf32>, vector<8x128xf32> -> vector<8x128xf32>
    %87 = vector.broadcast %5 : vector<1x128xf32> to vector<8x128xf32>
    %88 = arith.addf %86, %87 : vector<8x128xf32>
    %89 = arith.addf %88, %85 : vector<8x128xf32>
    %90 = arith.negf %89 : vector<8x128xf32>
    %91 = math.exp %90 : vector<8x128xf32>
    %cst_25 = arith.constant 1.000000e+00 : f32
    %92 = vector.broadcast %cst_25 : f32 to vector<8x128xf32>
    %93 = arith.addf %92, %91 : vector<8x128xf32>
    %94 = arith.divf %92, %93 : vector<8x128xf32>
    %95 = math.tanh %89 : vector<8x128xf32>
    %96 = vector.extract_strided_slice %94 {offsets = [0, 0], sizes = [8, 32], strides = [1, 1]} : vector<8x128xf32> to vector<8x32xf32>
    %97 = vector.extract_strided_slice %94 {offsets = [0, 32], sizes = [8, 32], strides = [1, 1]} : vector<8x128xf32> to vector<8x32xf32>
    %98 = vector.extract_strided_slice %95 {offsets = [0, 64], sizes = [8, 32], strides = [1, 1]} : vector<8x128xf32> to vector<8x32xf32>
    %99 = vector.extract_strided_slice %94 {offsets = [0, 96], sizes = [8, 32], strides = [1, 1]} : vector<8x128xf32> to vector<8x32xf32>
    %100 = arith.mulf %97, %64 : vector<8x32xf32>
    %101 = arith.mulf %96, %98 : vector<8x32xf32>
    %102 = arith.addf %100, %101 : vector<8x32xf32>
    %103 = math.tanh %102 : vector<8x32xf32>
    %104 = arith.mulf %99, %103 : vector<8x32xf32>
    %cst_26 = arith.constant dense<0.000000e+00> : vector<8x128xf32>
    %105 = tpu.matmul %84, %2, %cst_26 {dimension_numbers = #tpu.dot_dimension_numbers<[1], [0], [0], [1], [0, 0, 1, 1], [], []>} : vector<8x32xf32>, vector<32x128xf32>, vector<8x128xf32> -> vector<8x128xf32>
    %106 = vector.extract_strided_slice %9 {offsets = [24, 0], sizes = [8, 128], strides = [1, 1]} : vector<64x128xf32> to vector<8x128xf32>
    %107 = arith.addf %106, %105 : vector<8x128xf32>
    %108 = arith.negf %107 : vector<8x128xf32>
    %109 = math.exp %108 : vector<8x128xf32>
    %cst_27 = arith.constant 1.000000e+00 : f32
    %110 = vector.broadcast %cst_27 : f32 to vector<8x128xf32>
    %111 = arith.addf %110, %109 : vector<8x128xf32>
    %112 = arith.divf %110, %111 : vector<8x128xf32>
    %113 = math.tanh %107 : vector<8x128xf32>
    %114 = vector.extract_strided_slice %112 {offsets = [0, 0], sizes = [8, 32], strides = [1, 1]} : vector<8x128xf32> to vector<8x32xf32>
    %115 = vector.extract_strided_slice %112 {offsets = [0, 32], sizes = [8, 32], strides = [1, 1]} : vector<8x128xf32> to vector<8x32xf32>
    %116 = vector.extract_strided_slice %113 {offsets = [0, 64], sizes = [8, 32], strides = [1, 1]} : vector<8x128xf32> to vector<8x32xf32>
    %117 = vector.extract_strided_slice %112 {offsets = [0, 96], sizes = [8, 32], strides = [1, 1]} : vector<8x128xf32> to vector<8x32xf32>
    %118 = arith.mulf %115, %82 : vector<8x32xf32>
    %119 = arith.mulf %114, %116 : vector<8x32xf32>
    %120 = arith.addf %118, %119 : vector<8x32xf32>
    %121 = math.tanh %120 : vector<8x32xf32>
    %122 = arith.mulf %117, %121 : vector<8x32xf32>
    %cst_28 = arith.constant dense<0.000000e+00> : vector<8x128xf32>
    %123 = tpu.matmul %104, %3, %cst_28 {dimension_numbers = #tpu.dot_dimension_numbers<[1], [0], [0], [1], [0, 0, 1, 1], [], []>} : vector<8x32xf32>, vector<32x128xf32>, vector<8x128xf32> -> vector<8x128xf32>
    %cst_29 = arith.constant dense<0.000000e+00> : vector<8x128xf32>
    %124 = tpu.matmul %84, %1, %cst_29 {dimension_numbers = #tpu.dot_dimension_numbers<[1], [0], [0], [1], [0, 0, 1, 1], [], []>} : vector<8x32xf32>, vector<32x128xf32>, vector<8x128xf32> -> vector<8x128xf32>
    %125 = vector.broadcast %5 : vector<1x128xf32> to vector<8x128xf32>
    %126 = arith.addf %124, %125 : vector<8x128xf32>
    %127 = arith.addf %126, %123 : vector<8x128xf32>
    %128 = arith.negf %127 : vector<8x128xf32>
    %129 = math.exp %128 : vector<8x128xf32>
    %cst_30 = arith.constant 1.000000e+00 : f32
    %130 = vector.broadcast %cst_30 : f32 to vector<8x128xf32>
    %131 = arith.addf %130, %129 : vector<8x128xf32>
    %132 = arith.divf %130, %131 : vector<8x128xf32>
    %133 = math.tanh %127 : vector<8x128xf32>
    %134 = vector.extract_strided_slice %132 {offsets = [0, 0], sizes = [8, 32], strides = [1, 1]} : vector<8x128xf32> to vector<8x32xf32>
    %135 = vector.extract_strided_slice %132 {offsets = [0, 32], sizes = [8, 32], strides = [1, 1]} : vector<8x128xf32> to vector<8x32xf32>
    %136 = vector.extract_strided_slice %133 {offsets = [0, 64], sizes = [8, 32], strides = [1, 1]} : vector<8x128xf32> to vector<8x32xf32>
    %137 = vector.extract_strided_slice %132 {offsets = [0, 96], sizes = [8, 32], strides = [1, 1]} : vector<8x128xf32> to vector<8x32xf32>
    %138 = arith.mulf %135, %102 : vector<8x32xf32>
    %139 = arith.mulf %134, %136 : vector<8x32xf32>
    %140 = arith.addf %138, %139 : vector<8x32xf32>
    %141 = math.tanh %140 : vector<8x32xf32>
    %142 = arith.mulf %137, %141 : vector<8x32xf32>
    %cst_31 = arith.constant dense<0.000000e+00> : vector<8x128xf32>
    %143 = tpu.matmul %122, %2, %cst_31 {dimension_numbers = #tpu.dot_dimension_numbers<[1], [0], [0], [1], [0, 0, 1, 1], [], []>} : vector<8x32xf32>, vector<32x128xf32>, vector<8x128xf32> -> vector<8x128xf32>
    %144 = vector.extract_strided_slice %9 {offsets = [32, 0], sizes = [8, 128], strides = [1, 1]} : vector<64x128xf32> to vector<8x128xf32>
    %145 = arith.addf %144, %143 : vector<8x128xf32>
    %146 = arith.negf %145 : vector<8x128xf32>
    %147 = math.exp %146 : vector<8x128xf32>
    %cst_32 = arith.constant 1.000000e+00 : f32
    %148 = vector.broadcast %cst_32 : f32 to vector<8x128xf32>
    %149 = arith.addf %148, %147 : vector<8x128xf32>
    %150 = arith.divf %148, %149 : vector<8x128xf32>
    %151 = math.tanh %145 : vector<8x128xf32>
    %152 = vector.extract_strided_slice %150 {offsets = [0, 0], sizes = [8, 32], strides = [1, 1]} : vector<8x128xf32> to vector<8x32xf32>
    %153 = vector.extract_strided_slice %150 {offsets = [0, 32], sizes = [8, 32], strides = [1, 1]} : vector<8x128xf32> to vector<8x32xf32>
    %154 = vector.extract_strided_slice %151 {offsets = [0, 64], sizes = [8, 32], strides = [1, 1]} : vector<8x128xf32> to vector<8x32xf32>
    %155 = vector.extract_strided_slice %150 {offsets = [0, 96], sizes = [8, 32], strides = [1, 1]} : vector<8x128xf32> to vector<8x32xf32>
    %156 = arith.mulf %153, %120 : vector<8x32xf32>
    %157 = arith.mulf %152, %154 : vector<8x32xf32>
    %158 = arith.addf %156, %157 : vector<8x32xf32>
    %159 = math.tanh %158 : vector<8x32xf32>
    %160 = arith.mulf %155, %159 : vector<8x32xf32>
    %cst_33 = arith.constant dense<0.000000e+00> : vector<8x128xf32>
    %161 = tpu.matmul %142, %3, %cst_33 {dimension_numbers = #tpu.dot_dimension_numbers<[1], [0], [0], [1], [0, 0, 1, 1], [], []>} : vector<8x32xf32>, vector<32x128xf32>, vector<8x128xf32> -> vector<8x128xf32>
    %cst_34 = arith.constant dense<0.000000e+00> : vector<8x128xf32>
    %162 = tpu.matmul %122, %1, %cst_34 {dimension_numbers = #tpu.dot_dimension_numbers<[1], [0], [0], [1], [0, 0, 1, 1], [], []>} : vector<8x32xf32>, vector<32x128xf32>, vector<8x128xf32> -> vector<8x128xf32>
    %163 = vector.broadcast %5 : vector<1x128xf32> to vector<8x128xf32>
    %164 = arith.addf %162, %163 : vector<8x128xf32>
    %165 = arith.addf %164, %161 : vector<8x128xf32>
    %166 = arith.negf %165 : vector<8x128xf32>
    %167 = math.exp %166 : vector<8x128xf32>
    %cst_35 = arith.constant 1.000000e+00 : f32
    %168 = vector.broadcast %cst_35 : f32 to vector<8x128xf32>
    %169 = arith.addf %168, %167 : vector<8x128xf32>
    %170 = arith.divf %168, %169 : vector<8x128xf32>
    %171 = math.tanh %165 : vector<8x128xf32>
    %172 = vector.extract_strided_slice %170 {offsets = [0, 0], sizes = [8, 32], strides = [1, 1]} : vector<8x128xf32> to vector<8x32xf32>
    %173 = vector.extract_strided_slice %170 {offsets = [0, 32], sizes = [8, 32], strides = [1, 1]} : vector<8x128xf32> to vector<8x32xf32>
    %174 = vector.extract_strided_slice %171 {offsets = [0, 64], sizes = [8, 32], strides = [1, 1]} : vector<8x128xf32> to vector<8x32xf32>
    %175 = vector.extract_strided_slice %170 {offsets = [0, 96], sizes = [8, 32], strides = [1, 1]} : vector<8x128xf32> to vector<8x32xf32>
    %176 = arith.mulf %173, %140 : vector<8x32xf32>
    %177 = arith.mulf %172, %174 : vector<8x32xf32>
    %178 = arith.addf %176, %177 : vector<8x32xf32>
    %179 = math.tanh %178 : vector<8x32xf32>
    %180 = arith.mulf %175, %179 : vector<8x32xf32>
    %cst_36 = arith.constant dense<0.000000e+00> : vector<8x128xf32>
    %181 = tpu.matmul %160, %2, %cst_36 {dimension_numbers = #tpu.dot_dimension_numbers<[1], [0], [0], [1], [0, 0, 1, 1], [], []>} : vector<8x32xf32>, vector<32x128xf32>, vector<8x128xf32> -> vector<8x128xf32>
    %182 = vector.extract_strided_slice %9 {offsets = [40, 0], sizes = [8, 128], strides = [1, 1]} : vector<64x128xf32> to vector<8x128xf32>
    %183 = arith.addf %182, %181 : vector<8x128xf32>
    %184 = arith.negf %183 : vector<8x128xf32>
    %185 = math.exp %184 : vector<8x128xf32>
    %cst_37 = arith.constant 1.000000e+00 : f32
    %186 = vector.broadcast %cst_37 : f32 to vector<8x128xf32>
    %187 = arith.addf %186, %185 : vector<8x128xf32>
    %188 = arith.divf %186, %187 : vector<8x128xf32>
    %189 = math.tanh %183 : vector<8x128xf32>
    %190 = vector.extract_strided_slice %188 {offsets = [0, 0], sizes = [8, 32], strides = [1, 1]} : vector<8x128xf32> to vector<8x32xf32>
    %191 = vector.extract_strided_slice %188 {offsets = [0, 32], sizes = [8, 32], strides = [1, 1]} : vector<8x128xf32> to vector<8x32xf32>
    %192 = vector.extract_strided_slice %189 {offsets = [0, 64], sizes = [8, 32], strides = [1, 1]} : vector<8x128xf32> to vector<8x32xf32>
    %193 = vector.extract_strided_slice %188 {offsets = [0, 96], sizes = [8, 32], strides = [1, 1]} : vector<8x128xf32> to vector<8x32xf32>
    %194 = arith.mulf %191, %158 : vector<8x32xf32>
    %195 = arith.mulf %190, %192 : vector<8x32xf32>
    %196 = arith.addf %194, %195 : vector<8x32xf32>
    %197 = math.tanh %196 : vector<8x32xf32>
    %198 = arith.mulf %193, %197 : vector<8x32xf32>
    %cst_38 = arith.constant dense<0.000000e+00> : vector<8x128xf32>
    %199 = tpu.matmul %180, %3, %cst_38 {dimension_numbers = #tpu.dot_dimension_numbers<[1], [0], [0], [1], [0, 0, 1, 1], [], []>} : vector<8x32xf32>, vector<32x128xf32>, vector<8x128xf32> -> vector<8x128xf32>
    %cst_39 = arith.constant dense<0.000000e+00> : vector<8x128xf32>
    %200 = tpu.matmul %160, %1, %cst_39 {dimension_numbers = #tpu.dot_dimension_numbers<[1], [0], [0], [1], [0, 0, 1, 1], [], []>} : vector<8x32xf32>, vector<32x128xf32>, vector<8x128xf32> -> vector<8x128xf32>
    %201 = vector.broadcast %5 : vector<1x128xf32> to vector<8x128xf32>
    %202 = arith.addf %200, %201 : vector<8x128xf32>
    %203 = arith.addf %202, %199 : vector<8x128xf32>
    %204 = arith.negf %203 : vector<8x128xf32>
    %205 = math.exp %204 : vector<8x128xf32>
    %cst_40 = arith.constant 1.000000e+00 : f32
    %206 = vector.broadcast %cst_40 : f32 to vector<8x128xf32>
    %207 = arith.addf %206, %205 : vector<8x128xf32>
    %208 = arith.divf %206, %207 : vector<8x128xf32>
    %209 = math.tanh %203 : vector<8x128xf32>
    %210 = vector.extract_strided_slice %208 {offsets = [0, 0], sizes = [8, 32], strides = [1, 1]} : vector<8x128xf32> to vector<8x32xf32>
    %211 = vector.extract_strided_slice %208 {offsets = [0, 32], sizes = [8, 32], strides = [1, 1]} : vector<8x128xf32> to vector<8x32xf32>
    %212 = vector.extract_strided_slice %209 {offsets = [0, 64], sizes = [8, 32], strides = [1, 1]} : vector<8x128xf32> to vector<8x32xf32>
    %213 = vector.extract_strided_slice %208 {offsets = [0, 96], sizes = [8, 32], strides = [1, 1]} : vector<8x128xf32> to vector<8x32xf32>
    %214 = arith.mulf %211, %178 : vector<8x32xf32>
    %215 = arith.mulf %210, %212 : vector<8x32xf32>
    %216 = arith.addf %214, %215 : vector<8x32xf32>
    %217 = math.tanh %216 : vector<8x32xf32>
    %218 = arith.mulf %213, %217 : vector<8x32xf32>
    %cst_41 = arith.constant dense<0.000000e+00> : vector<8x128xf32>
    %219 = tpu.matmul %198, %2, %cst_41 {dimension_numbers = #tpu.dot_dimension_numbers<[1], [0], [0], [1], [0, 0, 1, 1], [], []>} : vector<8x32xf32>, vector<32x128xf32>, vector<8x128xf32> -> vector<8x128xf32>
    %220 = vector.extract_strided_slice %9 {offsets = [48, 0], sizes = [8, 128], strides = [1, 1]} : vector<64x128xf32> to vector<8x128xf32>
    %221 = arith.addf %220, %219 : vector<8x128xf32>
    %222 = arith.negf %221 : vector<8x128xf32>
    %223 = math.exp %222 : vector<8x128xf32>
    %cst_42 = arith.constant 1.000000e+00 : f32
    %224 = vector.broadcast %cst_42 : f32 to vector<8x128xf32>
    %225 = arith.addf %224, %223 : vector<8x128xf32>
    %226 = arith.divf %224, %225 : vector<8x128xf32>
    %227 = math.tanh %221 : vector<8x128xf32>
    %228 = vector.extract_strided_slice %226 {offsets = [0, 0], sizes = [8, 32], strides = [1, 1]} : vector<8x128xf32> to vector<8x32xf32>
    %229 = vector.extract_strided_slice %226 {offsets = [0, 32], sizes = [8, 32], strides = [1, 1]} : vector<8x128xf32> to vector<8x32xf32>
    %230 = vector.extract_strided_slice %227 {offsets = [0, 64], sizes = [8, 32], strides = [1, 1]} : vector<8x128xf32> to vector<8x32xf32>
    %231 = vector.extract_strided_slice %226 {offsets = [0, 96], sizes = [8, 32], strides = [1, 1]} : vector<8x128xf32> to vector<8x32xf32>
    %232 = arith.mulf %229, %196 : vector<8x32xf32>
    %233 = arith.mulf %228, %230 : vector<8x32xf32>
    %234 = arith.addf %232, %233 : vector<8x32xf32>
    %235 = math.tanh %234 : vector<8x32xf32>
    %236 = arith.mulf %231, %235 : vector<8x32xf32>
    %cst_43 = arith.constant dense<0.000000e+00> : vector<8x128xf32>
    %237 = tpu.matmul %218, %3, %cst_43 {dimension_numbers = #tpu.dot_dimension_numbers<[1], [0], [0], [1], [0, 0, 1, 1], [], []>} : vector<8x32xf32>, vector<32x128xf32>, vector<8x128xf32> -> vector<8x128xf32>
    %cst_44 = arith.constant dense<0.000000e+00> : vector<8x128xf32>
    %238 = tpu.matmul %198, %1, %cst_44 {dimension_numbers = #tpu.dot_dimension_numbers<[1], [0], [0], [1], [0, 0, 1, 1], [], []>} : vector<8x32xf32>, vector<32x128xf32>, vector<8x128xf32> -> vector<8x128xf32>
    %239 = vector.broadcast %5 : vector<1x128xf32> to vector<8x128xf32>
    %240 = arith.addf %238, %239 : vector<8x128xf32>
    %241 = arith.addf %240, %237 : vector<8x128xf32>
    %242 = arith.negf %241 : vector<8x128xf32>
    %243 = math.exp %242 : vector<8x128xf32>
    %cst_45 = arith.constant 1.000000e+00 : f32
    %244 = vector.broadcast %cst_45 : f32 to vector<8x128xf32>
    %245 = arith.addf %244, %243 : vector<8x128xf32>
    %246 = arith.divf %244, %245 : vector<8x128xf32>
    %247 = math.tanh %241 : vector<8x128xf32>
    %248 = vector.extract_strided_slice %246 {offsets = [0, 0], sizes = [8, 32], strides = [1, 1]} : vector<8x128xf32> to vector<8x32xf32>
    %249 = vector.extract_strided_slice %246 {offsets = [0, 32], sizes = [8, 32], strides = [1, 1]} : vector<8x128xf32> to vector<8x32xf32>
    %250 = vector.extract_strided_slice %247 {offsets = [0, 64], sizes = [8, 32], strides = [1, 1]} : vector<8x128xf32> to vector<8x32xf32>
    %251 = vector.extract_strided_slice %246 {offsets = [0, 96], sizes = [8, 32], strides = [1, 1]} : vector<8x128xf32> to vector<8x32xf32>
    %252 = arith.mulf %249, %216 : vector<8x32xf32>
    %253 = arith.mulf %248, %250 : vector<8x32xf32>
    %254 = arith.addf %252, %253 : vector<8x32xf32>
    %255 = math.tanh %254 : vector<8x32xf32>
    %256 = arith.mulf %251, %255 : vector<8x32xf32>
    %cst_46 = arith.constant dense<0.000000e+00> : vector<8x128xf32>
    %257 = tpu.matmul %236, %2, %cst_46 {dimension_numbers = #tpu.dot_dimension_numbers<[1], [0], [0], [1], [0, 0, 1, 1], [], []>} : vector<8x32xf32>, vector<32x128xf32>, vector<8x128xf32> -> vector<8x128xf32>
    %258 = vector.extract_strided_slice %9 {offsets = [56, 0], sizes = [8, 128], strides = [1, 1]} : vector<64x128xf32> to vector<8x128xf32>
    %259 = arith.addf %258, %257 : vector<8x128xf32>
    %260 = arith.negf %259 : vector<8x128xf32>
    %261 = math.exp %260 : vector<8x128xf32>
    %cst_47 = arith.constant 1.000000e+00 : f32
    %262 = vector.broadcast %cst_47 : f32 to vector<8x128xf32>
    %263 = arith.addf %262, %261 : vector<8x128xf32>
    %264 = arith.divf %262, %263 : vector<8x128xf32>
    %265 = math.tanh %259 : vector<8x128xf32>
    %266 = vector.extract_strided_slice %264 {offsets = [0, 0], sizes = [8, 32], strides = [1, 1]} : vector<8x128xf32> to vector<8x32xf32>
    %267 = vector.extract_strided_slice %264 {offsets = [0, 32], sizes = [8, 32], strides = [1, 1]} : vector<8x128xf32> to vector<8x32xf32>
    %268 = vector.extract_strided_slice %265 {offsets = [0, 64], sizes = [8, 32], strides = [1, 1]} : vector<8x128xf32> to vector<8x32xf32>
    %269 = vector.extract_strided_slice %264 {offsets = [0, 96], sizes = [8, 32], strides = [1, 1]} : vector<8x128xf32> to vector<8x32xf32>
    %270 = arith.mulf %267, %234 : vector<8x32xf32>
    %271 = arith.mulf %266, %268 : vector<8x32xf32>
    %272 = arith.addf %270, %271 : vector<8x32xf32>
    %273 = math.tanh %272 : vector<8x32xf32>
    %274 = arith.mulf %269, %273 : vector<8x32xf32>
    %cst_48 = arith.constant dense<0.000000e+00> : vector<8x128xf32>
    %275 = tpu.matmul %256, %3, %cst_48 {dimension_numbers = #tpu.dot_dimension_numbers<[1], [0], [0], [1], [0, 0, 1, 1], [], []>} : vector<8x32xf32>, vector<32x128xf32>, vector<8x128xf32> -> vector<8x128xf32>
    %cst_49 = arith.constant dense<0.000000e+00> : vector<8x128xf32>
    %276 = tpu.matmul %236, %1, %cst_49 {dimension_numbers = #tpu.dot_dimension_numbers<[1], [0], [0], [1], [0, 0, 1, 1], [], []>} : vector<8x32xf32>, vector<32x128xf32>, vector<8x128xf32> -> vector<8x128xf32>
    %277 = vector.broadcast %5 : vector<1x128xf32> to vector<8x128xf32>
    %278 = arith.addf %276, %277 : vector<8x128xf32>
    %279 = arith.addf %278, %275 : vector<8x128xf32>
    %280 = arith.negf %279 : vector<8x128xf32>
    %281 = math.exp %280 : vector<8x128xf32>
    %cst_50 = arith.constant 1.000000e+00 : f32
    %282 = vector.broadcast %cst_50 : f32 to vector<8x128xf32>
    %283 = arith.addf %282, %281 : vector<8x128xf32>
    %284 = arith.divf %282, %283 : vector<8x128xf32>
    %285 = math.tanh %279 : vector<8x128xf32>
    %286 = vector.extract_strided_slice %284 {offsets = [0, 0], sizes = [8, 32], strides = [1, 1]} : vector<8x128xf32> to vector<8x32xf32>
    %287 = vector.extract_strided_slice %284 {offsets = [0, 32], sizes = [8, 32], strides = [1, 1]} : vector<8x128xf32> to vector<8x32xf32>
    %288 = vector.extract_strided_slice %285 {offsets = [0, 64], sizes = [8, 32], strides = [1, 1]} : vector<8x128xf32> to vector<8x32xf32>
    %289 = vector.extract_strided_slice %284 {offsets = [0, 96], sizes = [8, 32], strides = [1, 1]} : vector<8x128xf32> to vector<8x32xf32>
    %290 = arith.mulf %287, %254 : vector<8x32xf32>
    %291 = arith.mulf %286, %288 : vector<8x32xf32>
    %292 = arith.addf %290, %291 : vector<8x32xf32>
    %293 = math.tanh %292 : vector<8x32xf32>
    %294 = arith.mulf %289, %293 : vector<8x32xf32>
    %cst_51 = arith.constant dense<0.000000e+00> : vector<8x128xf32>
    %295 = tpu.matmul %294, %3, %cst_51 {dimension_numbers = #tpu.dot_dimension_numbers<[1], [0], [0], [1], [0, 0, 1, 1], [], []>} : vector<8x32xf32>, vector<32x128xf32>, vector<8x128xf32> -> vector<8x128xf32>
    %cst_52 = arith.constant dense<0.000000e+00> : vector<8x128xf32>
    %296 = tpu.matmul %274, %1, %cst_52 {dimension_numbers = #tpu.dot_dimension_numbers<[1], [0], [0], [1], [0, 0, 1, 1], [], []>} : vector<8x32xf32>, vector<32x128xf32>, vector<8x128xf32> -> vector<8x128xf32>
    %297 = vector.broadcast %5 : vector<1x128xf32> to vector<8x128xf32>
    %298 = arith.addf %296, %297 : vector<8x128xf32>
    %299 = arith.addf %298, %295 : vector<8x128xf32>
    %300 = arith.negf %299 : vector<8x128xf32>
    %301 = math.exp %300 : vector<8x128xf32>
    %cst_53 = arith.constant 1.000000e+00 : f32
    %302 = vector.broadcast %cst_53 : f32 to vector<8x128xf32>
    %303 = arith.addf %302, %301 : vector<8x128xf32>
    %304 = arith.divf %302, %303 : vector<8x128xf32>
    %305 = math.tanh %299 : vector<8x128xf32>
    %306 = vector.extract_strided_slice %304 {offsets = [0, 0], sizes = [8, 32], strides = [1, 1]} : vector<8x128xf32> to vector<8x32xf32>
    %307 = vector.extract_strided_slice %304 {offsets = [0, 32], sizes = [8, 32], strides = [1, 1]} : vector<8x128xf32> to vector<8x32xf32>
    %308 = vector.extract_strided_slice %305 {offsets = [0, 64], sizes = [8, 32], strides = [1, 1]} : vector<8x128xf32> to vector<8x32xf32>
    %309 = vector.extract_strided_slice %304 {offsets = [0, 96], sizes = [8, 32], strides = [1, 1]} : vector<8x128xf32> to vector<8x32xf32>
    %310 = arith.mulf %307, %292 : vector<8x32xf32>
    %311 = arith.mulf %306, %308 : vector<8x32xf32>
    %312 = arith.addf %310, %311 : vector<8x32xf32>
    %313 = math.tanh %312 : vector<8x32xf32>
    %314 = arith.mulf %309, %313 : vector<8x32xf32>
    %c0_54 = arith.constant 0 : index
    %c0_55 = arith.constant 0 : index
    %315 = vector.load %arg7[%c0_54, %c0_55] : memref<32x128xf32, #tpu.memory_space<vmem>>, vector<32x128xf32>
    %cst_56 = arith.constant dense<0.000000e+00> : vector<8x128xf32>
    %316 = tpu.matmul %314, %315, %cst_56 {dimension_numbers = #tpu.dot_dimension_numbers<[1], [0], [0], [1], [0, 0, 1, 1], [], []>} : vector<8x32xf32>, vector<32x128xf32>, vector<8x128xf32> -> vector<8x128xf32>
    %c0_57 = arith.constant 0 : index
    %c0_58 = arith.constant 0 : index
    %317 = vector.load %arg8[%c0_57, %c0_58] : memref<1x128xf32, #tpu.memory_space<vmem>>, vector<1x128xf32>
    %318 = vector.broadcast %317 : vector<1x128xf32> to vector<8x128xf32>
    %319 = arith.addf %316, %318 : vector<8x128xf32>
    %c0_59 = arith.constant 0 : index
    %c0_60 = arith.constant 0 : index
    %320 = vector.load %arg9[%c0_59, %c0_60] : memref<8x128xf32, #tpu.memory_space<vmem>>, vector<8x128xf32>
    tpu.vector_store %arg9[%c0_59, %c0_60], %319 {strides = array<i32>} : memref<8x128xf32, #tpu.memory_space<vmem>>, vector<8x128xf32>,
    return
  }
}

</mosaic_0001>

<bundles_post_ra>
// kernel: lstm_model_forward.1
= control target key start
LH: loop header
LB: loop body
LE: loop exit
PB: predicated region body
PF: predicated region fallthrough
CT: control target
= control target key end

     0   :  { %v3070_v0 = vmov 0.0   ;;  %vm3071_vm0 = vmmov 0   ;;  %vm62_vm1 = vcmask 130048   ;;  %s3072_s26 = smov 64   ;;  %s3073_s27 = smov 32   ;;  %vm192_vm2 = vcmask 261120   ;;  %s3705_s1 = inlined_call_operand.vmem [shape: f32[16,128], index: 1, kind: input, shape index: {}]   ;;  %s3706_s2 = inlined_call_operand.vmem [shape: f32[32,128], index: 2, kind: input, shape index: {}]   ;;  %s3707_s0 = inlined_call_operand.vmem [shape: f32[64,16], index: 0, kind: input, shape index: {}]   ;;  %s3708_s3 = inlined_call_operand.vmem [shape: f32[1,128], index: 3, kind: input, shape index: {}]   ;;  %s3709_s5 = inlined_call_operand.vmem [shape: f32[32,128], index: 5, kind: input, shape index: {}]   ;;  %s3710_s4 = inlined_call_operand.vmem [shape: f32[32,128], index: 4, kind: input, shape index: {}]   ;;  %s3711_s6 = inlined_call_operand.vmem [shape: f32[1,128], index: 6, kind: input, shape index: {}]   ;;  %s3712_s7 = inlined_call_operand.vmem [shape: f32[32,128], index: 7, kind: input, shape index: {}]   ;;  %s3713_s8 = inlined_call_operand.vmem [shape: f32[1,128], index: 8, kind: input, shape index: {}]   ;;  %s3714_s9 = inlined_call_operand.vmem [shape: f32[8,128], index: 9, kind: output, shape index: {}]  }
   0x1   :  { %2649 = vmatprep.subr.mxu1 %v3070_v0  ;;  %v33_v1 = vld [vmem:[%s3705_s1 + $0x8] sm:$0xff]  ;;  %v3131_v2 = vld [vmem:[%s3706_s2 + $0x18] sm:$0xff]  ;;  %v32_v3 = vld [vmem:[%s3705_s1] sm:$0xff]  ;;  %2657 = vmatprep.mubr.msk.f32.mxu1 %vm3071_vm0, %v3070_v0 }
   0x2   :  { %2633 = vmatprep.subr.mxu0 %v33_v1  ;;  %2650 = vmatpush3.msra.mxu1 %v3131_v2  ;;  %v3142_v4 = vld [vmem:[%s3706_s2 + $0x10] sm:$0xff]  ;;  %v48_v5 = vld [vmem:[%s3707_s0] sm:$0xff]  ;;  %v49_v6 = vld [vmem:[%s3707_s0 + $0x8] sm:$0xff] }
   0x3   :  { %2634 = vmatpush3.msra.mxu0 %v33_v1  ;;  %2651 = vmatprep.subr.mxu1 %v3070_v0  ;;  %v3155_v7 = vld [vmem:[%s3706_s2 + $0x8] sm:$0xff]  ;;  %v3163_v8 = vld [vmem:[%s3706_s2] sm:$0xff]  ;;  %v50_v26 = vld [vmem:[%s3707_s0 + $0x10] sm:$0xff] }
   0x4   :  { %2635 = vmatprep.subr.mxu0 %v32_v3  ;;  %2652 = vmatpush3.msra.mxu1 %v3142_v4  ;;  %v3186_v10 = vld [vmem:[%s3708_s3] ss:$0 sm:$0xff]  ;;  %v51_v27 = vld [vmem:[%s3707_s0 + $0x18] sm:$0xff]  ;;  %v3209_v29 = vld [vmem:[%s3709_s5 + $0x10] sm:$0xff] }
   0x5   :  { %2636 = vmatpush3.msra.mxu0 %v32_v3  ;;  %2637 = vmatprep.mubr.msk.f32.mxu0 %vm62_vm1, %v48_v5  ;;  %v3203_v28 = vld [vmem:[%s3709_s5 + $0x18] sm:$0xff]  ;;  %v52_v30 = vld [vmem:[%s3707_s0 + $0x20] sm:$0xff]  ;;  %v53_v31 = vld [vmem:[%s3707_s0 + $0x28] sm:$0xff] }
   0x6   :  { %2653 = vmatprep.subr.mxu1 %v3070_v0  ;;  %2638 = vmatmul.mubr.msk.f32.vlgmr.msra.gmra.mxu0 %vm62_vm1, %v49_v6  ;;  %v3228_v33 = vld [vmem:[%s3709_s5 + $0x8] sm:$0xff]  ;;  %v54_v34 = vld [vmem:[%s3707_s0 + $0x30] sm:$0xff]  ;;  %v55_v35 = vld [vmem:[%s3707_s0 + $0x38] sm:$0xff] }
   0x7   :  { %2654 = vmatpush3.msra.mxu1 %v3155_v7  ;;  %2671 = vmatprep.subr.mxu0 %v3070_v0  ;;  %v3243_v36 = vld [vmem:[%s3709_s5] sm:$0xff]  ;;  %v3264_v39 = vld [vmem:[%s3710_s4 + $0x18] sm:$0xff]  ;;  %v3270_v41 = vld [vmem:[%s3710_s4 + $0x10] sm:$0xff] }
   0x8   :  { %2655 = vmatprep.subr.mxu1 %v3070_v0  ;;  %2640 = vmatprep.mubr.msk.f32.mxu0 %vm62_vm1, %v50_v26  ;;  %v3279_v42 = vld [vmem:[%s3710_s4 + $0x8] sm:$0xff]  ;;  %v3286_v43 = vld [vmem:[%s3710_s4] sm:$0xff] }
   0x9   :  { %2656 = vmatpush3.msra.mxu1 %v3163_v8  ;;  %2672 = vmatpush3.msra.mxu0 %v3203_v28  ;;  %v3320_v56 = vld [vmem:[%s3711_s6] ss:$0 sm:$0xff] }
   0xa   :  { %2658 = vmatmul.mubr.f32.vlgmr.msra.gmra.mxu1 %v3070_v0  ;;  %2660 = vmatprep.subr.mxu1 %v3070_v0 }
   0xb   :  { %2661 = vmatpush3.msra.mxu1 %v3131_v2  ;;  %2668 = vmatprep.mubr.msk.f32.mxu1 %vm3071_vm0, %v3070_v0 }
   0xc   :  { %2662 = vmatprep.subr.mxu1 %v3070_v0  ;;  %2641 = vmatmul.mubr.msk.f32.gmra.mxu0 %vm62_vm1, %v51_v27 }
   0xd   :  { %2663 = vmatpush3.msra.mxu1 %v3142_v4  ;;  %2673 = vmatprep.subr.mxu0 %v3070_v0 }
   0xe   :  { %2664 = vmatprep.subr.mxu1 %v3070_v0  ;;  %2674 = vmatpush3.msra.mxu0 %v3209_v29 }
   0xf   :  { %2665 = vmatpush3.msra.mxu1 %v3155_v7  ;;  %2643 = vmatprep.mubr.msk.f32.mxu0 %vm62_vm1, %v52_v30 }
  0x10   :  { %2666 = vmatprep.subr.mxu1 %v3070_v0  ;;  %2675 = vmatprep.subr.mxu0 %v3070_v0 }
  0x11   :  { %2667 = vmatpush3.msra.mxu1 %v3163_v8  ;;  %2644 = vmatmul.mubr.msk.f32.gmra.mxu0 %vm62_vm1, %v53_v31 }
  0x12   :  { %2682 = vmatprep.subr.mxu1 %v3070_v0  ;;  %2676 = vmatpush3.msra.mxu0 %v3228_v33 }
  0x13   :  { %2646 = vmatprep.mubr.msk.f32.mxu0 %vm62_vm1, %v54_v34  ;;  %2677 = vmatprep.subr.mxu0 %v3070_v0 }
  0x14   :  { %2678 = vmatpush3.msra.mxu0 %v3243_v36 }
  0x15   :  { %2647 = vmatmul.mubr.msk.f32.gmra.mxu0 %vm62_vm1, %v55_v35  ;;  %2693 = vmatprep.subr.mxu0 %v3070_v0 }
  0x16   :  { %2679 = vmatprep.mubr.msk.f32.mxu0 %vm3071_vm0, %v3070_v0 }
  0x19   :  { %2680 = vmatmul.mubr.f32.vlgmr.msra.gmra.mxu0 %v3070_v0 }
  0x1a   :  { %2694 = vmatpush3.msra.mxu0 %v3131_v2  ;;  %2701 = vmatprep.mubr.msk.f32.mxu0 %vm3071_vm0, %v3070_v0 }
  0x1b   :  { %2695 = vmatprep.subr.mxu0 %v3070_v0 }
  0x1c   :  { %2696 = vmatpush3.msra.mxu0 %v3142_v4 }
  0x1d   :  { %2697 = vmatprep.subr.mxu0 %v3070_v0 }
  0x1e   :  { %2698 = vmatpush3.msra.mxu0 %v3155_v7 }
  0x1f   :  { %2699 = vmatprep.subr.mxu0 %v3070_v0 }
  0x20   :  { %2700 = vmatpush3.msra.mxu0 %v3163_v8 }
  0x21   :  { %2715 = vmatprep.subr.mxu0 %v3070_v0 }
  0xc6   :  { %v3181_v9 = vpop.f32.mrf.mxu0 }
  0xc7   :  { %v159_v52 = vadd.f32 %v3181_v9, %v3186_v10 }
  0xc8   :  { %v153_v11 = vpop.f32.mrf.mxu0 }
  0xc9   :  { %v154_v12 = vadd.f32 %v3186_v10, %v153_v11 }
  0xca   :  { %v262_v13 = vpop.f32.mrf.mxu1 }
  0xcb   :  { %v266_v14 = vadd.f32 %v262_v13, %v154_v12 }
  0xcc   :  { %v2659_v15 = vpop.f32.mrf.mxu1  ;;  %v3303_v44 = vpop.f32.mrf.mxu0 }
  0xcd   :  { %2928 = vtanh.f32 %v266_v14  ;;  %v2457_v17 = vmul.f32 -1.442695, %v266_v14 }
  0xce   :  { %v3305_v45 = vpop.f32.mrf.mxu0 }
  0xcf   :  { %2930 = vpow2.f32 %v2457_v17  ;;  %v164_v34 = vadd.f32 %v3186_v10, %v3305_v45 }
  0xd1   :  { %v3307_v46 = vpop.f32.mrf.mxu0 }
  0xd3   :  { %v3309_v47 = vpop.f32.mrf.mxu0 }
  0xd5   :  { %v3311_v48 = vpop.f32.mrf.mxu0 }
  0xd7   :  { %v3313_v49 = vpop.f32.mrf.mxu0 }
  0xd9   :  { %v457_v50 = vpop.f32.mrf.mxu0 }
  0xda   :  { %v2929_v16 = vpop.eup %2928 }
  0xdb   :  { %276 = vrot.lane.b32.xlu0 %v2929_v16, %s3072_s26  ;;  %v2681_v51 = vpop.f32.mrf.mxu0 }
  0xdc   :  { %v2931_v18 = vpop.eup %2930 }
  0xdd   :  { %v270_v19 = vadd.f32 1.0, %v2931_v18 }
  0xdf   :  { %2932 = vrcp.f32 %v270_v19 }
  0xec   :  { %v2933_v20 = vpop.eup %2932 }
  0xed   :  { %v274_v23 = vmul.f32 0.0, %v2933_v20 }
 0x14d   :  { %v277_v21 = vpop.permute.xlu0 %276 }
 0x14e   :  { %v279_v22 = vmul.f32 %v2933_v20, %v277_v21 }
 0x150   :  { %281 = vrot.lane.b32.xlu0 %v279_v22, %s3073_s27 }
 0x1c2   :  { %v282_v24 = vpop.permute.xlu0 %281 }
 0x1c3   :  { %v3191_v25 = vadd.f32 %v282_v24, %v274_v23 }
 0x1c5   :  { %2934 = vtanh.f32 %v3191_v25 }
 0x1d2   :  { %v2935_v32 = vpop.eup %2934 }
 0x1d3   :  { %287 = vrot.lane.b32.xlu1 %v2935_v32, %s3072_s26 }
 0x245   :  { %v288_v37 = vpop.permute.xlu1 %287 }
 0x246   :  { %v290_v38 = vmul.f32 %v2933_v20, %v288_v37 }
 0x248   :  { %292 = vrot.lane.b32.xlu1 %v290_v38, %s3073_s27 }
 0x2ba   :  { %v293_v40 = vpop.permute.xlu1 %292 }
 0x2bb   :  { %2669 = vmatmul.mubr.msk.f32.vlgmr.msra.gmra.mxu1 %vm192_vm2, %v293_v40 }
 0x2bc   :  { %2683 = vmatpush3.msra.mxu1 %v3264_v39  ;;  %2690 = vmatprep.mubr.msk.f32.mxu1 %vm3071_vm0, %v3070_v0 }
 0x2bd   :  { %2684 = vmatprep.subr.mxu1 %v3070_v0 }
 0x2be   :  { %2685 = vmatpush3.msra.mxu1 %v3270_v41 }
 0x2bf   :  { %2686 = vmatprep.subr.mxu1 %v3070_v0 }
 0x2c0   :  { %2687 = vmatpush3.msra.mxu1 %v3279_v42 }
 0x2c1   :  { %2688 = vmatprep.subr.mxu1 %v3070_v0 }
 0x2c2   :  { %2689 = vmatpush3.msra.mxu1 %v3286_v43 }
 0x2c3   :  { %2691 = vmatmul.mubr.msk.f32.vlgmr.msra.gmra.mxu1 %vm192_vm2, %v293_v40  ;;  %2704 = vmatprep.subr.mxu1 %v3070_v0 }
 0x2c4   :  { %2705 = vmatpush3.msra.mxu1 %v3203_v28  ;;  %2712 = vmatprep.mubr.msk.f32.mxu1 %vm3071_vm0, %v3070_v0 }
 0x2c5   :  { %2706 = vmatprep.subr.mxu1 %v3070_v0 }
 0x2c6   :  { %2707 = vmatpush3.msra.mxu1 %v3209_v29 }
 0x2c7   :  { %2708 = vmatprep.subr.mxu1 %v3070_v0 }
 0x2c8   :  { %2709 = vmatpush3.msra.mxu1 %v3228_v33 }
 0x2c9   :  { %2710 = vmatprep.subr.mxu1 %v3070_v0 }
 0x2ca   :  { %2711 = vmatpush3.msra.mxu1 %v3243_v36 }
 0x2cb   :  { %2726 = vmatprep.subr.mxu1 %v3070_v0 }
 0x37b   :  { %v362_v53 = vpop.f32.mrf.mxu1 }
 0x37c   :  { %v366_v54 = vadd.f32 %v362_v53, %v159_v52 }
 0x37d   :  { %v2670_v55 = vpop.f32.mrf.mxu1 }
 0x37e   :  { %2936 = vtanh.f32 %v366_v54  ;;  %v2459_v63 = vmul.f32 -1.442695, %v366_v54 }
 0x383   :  { %v533_v57 = vpop.f32.mrf.mxu1 }
 0x384   :  { %v534_v58 = vadd.f32 %v3320_v56, %v533_v57 }
 0x385   :  { %v2692_v59 = vpop.f32.mrf.mxu1 }
 0x386   :  { %v537_v60 = vadd.f32 %v534_v58, %v457_v50 }
 0x388   :  { %2938 = vtanh.f32 %v537_v60  ;;  %v2462_v1 = vmul.f32 -1.442695, %v537_v60 }
 0x389   :  { %2940 = vpow2.f32 %v2459_v63 }
 0x38a   :  { %2942 = vpow2.f32 %v2462_v1 }
 0x38b   :  { %v2937_v61 = vpop.eup %2936 }
 0x38c   :  { %376 = vrot.lane.b32.xlu0 %v2937_v61, %s3072_s26 }
 0x395   :  { %v2939_v62 = vpop.eup %2938 }
 0x396   :  { %547 = vrot.lane.b32.xlu1 %v2939_v62, %s3072_s26  ;;  %v2941_v3 = vpop.eup %2940 }
 0x397   :  { %v370_v5 = vadd.f32 1.0, %v2941_v3  ;;  %v2943_v6 = vpop.eup %2942 }
 0x398   :  { %v541_v9 = vadd.f32 1.0, %v2943_v6 }
 0x399   :  { %2944 = vrcp.f32 %v370_v5 }
 0x39a   :  { %2946 = vrcp.f32 %v541_v9 }
 0x3a6   :  { %v2945_v11 = vpop.eup %2944 }
 0x3a7   :  { %v2947_v14 = vpop.eup %2946  ;;  %v374_v17 = vmul.f32 %v2945_v11, %v3191_v25 }
 0x3a8   :  { %v545_v20 = vmul.f32 0.0, %v2947_v14 }
 0x3fe   :  { %v377_v12 = vpop.permute.xlu0 %376 }
 0x3ff   :  { %v379_v13 = vmul.f32 %v2945_v11, %v377_v12 }
 0x401   :  { %381 = vrot.lane.b32.xlu0 %v379_v13, %s3073_s27 }
 0x408   :  { %v548_v15 = vpop.permute.xlu1 %547 }
 0x409   :  { %v550_v16 = vmul.f32 %v2947_v14, %v548_v15 }
 0x40b   :  { %552 = vrot.lane.b32.xlu1 %v550_v16, %s3073_s27 }
 0x473   :  { %v382_v18 = vpop.permute.xlu0 %381 }
 0x474   :  { %v3328_v19 = vadd.f32 %v382_v18, %v374_v17 }
 0x476   :  { %2948 = vtanh.f32 %v3328_v19 }
 0x47d   :  { %v553_v21 = vpop.permute.xlu1 %552 }
 0x47e   :  { %v3331_v22 = vadd.f32 %v553_v21, %v545_v20 }
 0x480   :  { %2950 = vtanh.f32 %v3331_v22 }
 0x483   :  { %v2949_v23 = vpop.eup %2948 }
 0x484   :  { %387 = vrot.lane.b32.xlu0 %v2949_v23, %s3072_s26 }
 0x48d   :  { %v2951_v24 = vpop.eup %2950 }
 0x48e   :  { %558 = vrot.lane.b32.xlu1 %v2951_v24, %s3072_s26 }
 0x4f6   :  { %v388_v26 = vpop.permute.xlu0 %387 }
 0x4f7   :  { %v390_v27 = vmul.f32 %v2945_v11, %v388_v26  ;;  %v169_v26 = vadd.f32 %v3303_v44, %v3186_v10 }
 0x4f9   :  { %563 = vrot.lane.b32.xlu0 %v390_v27, %s3073_s27 }
 0x500   :  { %v559_v25 = vpop.permute.xlu1 %558 }
 0x501   :  { %v561_v30 = vmul.f32 %v2947_v14, %v559_v25 }
 0x503   :  { %663 = vrot.lane.b32.xlu1 %v561_v30, %s3073_s27 }
 0x56b   :  { %v564_v31 = vpop.permute.xlu0 %563 }
 0x56c   :  { %2702 = vmatmul.mubr.msk.f32.vlgmr.msra.gmra.mxu0 %vm192_vm2, %v564_v31 }
 0x56d   :  { %2716 = vmatpush3.msra.mxu0 %v3264_v39  ;;  %2723 = vmatprep.mubr.msk.f32.mxu0 %vm3071_vm0, %v3070_v0 }
 0x56e   :  { %2717 = vmatprep.subr.mxu0 %v3070_v0 }
 0x56f   :  { %2718 = vmatpush3.msra.mxu0 %v3270_v41 }
 0x570   :  { %2719 = vmatprep.subr.mxu0 %v3070_v0 }
 0x571   :  { %2720 = vmatpush3.msra.mxu0 %v3279_v42 }
 0x572   :  { %2721 = vmatprep.subr.mxu0 %v3070_v0 }
 0x573   :  { %2722 = vmatpush3.msra.mxu0 %v3286_v43 }
 0x574   :  { %2724 = vmatmul.mubr.msk.f32.vlgmr.msra.gmra.mxu0 %vm192_vm2, %v564_v31  ;;  %2737 = vmatprep.subr.mxu0 %v3070_v0 }
 0x575   :  { %v664_v32 = vpop.permute.xlu1 %663  ;;  %2738 = vmatpush3.msra.mxu0 %v3203_v28  ;;  %2745 = vmatprep.mubr.msk.f32.mxu0 %vm3071_vm0, %v3070_v0 }
 0x576   :  { %2713 = vmatmul.mubr.msk.f32.vlgmr.msra.gmra.mxu1 %vm192_vm2, %v664_v32  ;;  %2739 = vmatprep.subr.mxu0 %v3070_v0 }
 0x577   :  { %2727 = vmatpush3.msra.mxu1 %v3131_v2  ;;  %2734 = vmatprep.mubr.msk.f32.mxu1 %vm3071_vm0, %v3070_v0 }
 0x578   :  { %2728 = vmatprep.subr.mxu1 %v3070_v0  ;;  %2740 = vmatpush3.msra.mxu0 %v3209_v29 }
 0x579   :  { %2729 = vmatpush3.msra.mxu1 %v3142_v4  ;;  %2741 = vmatprep.subr.mxu0 %v3070_v0 }
 0x57a   :  { %2730 = vmatprep.subr.mxu1 %v3070_v0  ;;  %2742 = vmatpush3.msra.mxu0 %v3228_v33 }
 0x57b   :  { %2731 = vmatpush3.msra.mxu1 %v3155_v7  ;;  %2743 = vmatprep.subr.mxu0 %v3070_v0 }
 0x57c   :  { %2732 = vmatprep.subr.mxu1 %v3070_v0  ;;  %2744 = vmatpush3.msra.mxu0 %v3243_v36 }
 0x57d   :  { %2733 = vmatpush3.msra.mxu1 %v3163_v8  ;;  %2759 = vmatprep.subr.mxu0 %v3070_v0 }
 0x57e   :  { %2748 = vmatprep.subr.mxu1 %v3070_v0 }
 0x62c   :  { %v633_v35 = vpop.f32.mrf.mxu0 }
 0x62d   :  { %v637_v37 = vadd.f32 %v633_v35, %v164_v34 }
 0x62e   :  { %v2703_v38 = vpop.f32.mrf.mxu0 }
 0x62f   :  { %2952 = vtanh.f32 %v637_v37  ;;  %v2464_v58 = vmul.f32 -1.442695, %v637_v37 }
 0x634   :  { %v803_v40 = vpop.f32.mrf.mxu0 }
 0x635   :  { %v804_v50 = vadd.f32 %v3320_v56, %v803_v40 }
 0x636   :  { %v733_v51 = vpop.f32.mrf.mxu1  ;;  %v2725_v52 = vpop.f32.mrf.mxu0 }
 0x637   :  { %v807_v53 = vadd.f32 %v804_v50, %v733_v51 }
 0x638   :  { %v2714_v54 = vpop.f32.mrf.mxu1 }
 0x639   :  { %2954 = vtanh.f32 %v807_v53  ;;  %v2467_v45 = vmul.f32 -1.442695, %v807_v53 }
 0x63a   :  { %2956 = vpow2.f32 %v2464_v58 }
 0x63b   :  { %2958 = vpow2.f32 %v2467_v45 }
 0x63c   :  { %v2953_v55 = vpop.eup %2952 }
 0x63d   :  { %647 = vrot.lane.b32.xlu0 %v2953_v55, %s3072_s26 }
 0x646   :  { %v2955_v57 = vpop.eup %2954 }
 0x647   :  { %817 = vrot.lane.b32.xlu1 %v2955_v57, %s3072_s26  ;;  %v2957_v59 = vpop.eup %2956 }
 0x648   :  { %v641_v60 = vadd.f32 1.0, %v2957_v59  ;;  %v2959_v61 = vpop.eup %2958 }
 0x649   :  { %v811_v62 = vadd.f32 1.0, %v2959_v61 }
 0x64a   :  { %2960 = vrcp.f32 %v641_v60 }
 0x64b   :  { %2962 = vrcp.f32 %v811_v62 }
 0x657   :  { %v2961_v63 = vpop.eup %2960 }
 0x658   :  { %v2963_v5 = vpop.eup %2962  ;;  %v645_v11 = vmul.f32 %v2961_v63, %v3328_v19 }
 0x659   :  { %v815_v14 = vmul.f32 %v2963_v5, %v3331_v22 }
 0x6af   :  { %v648_v1 = vpop.permute.xlu0 %647 }
 0x6b0   :  { %v650_v3 = vmul.f32 %v2961_v63, %v648_v1 }
 0x6b2   :  { %652 = vrot.lane.b32.xlu0 %v650_v3, %s3073_s27 }
 0x6b9   :  { %v818_v6 = vpop.permute.xlu1 %817 }
 0x6ba   :  { %v820_v9 = vmul.f32 %v2963_v5, %v818_v6 }
 0x6bc   :  { %822 = vrot.lane.b32.xlu1 %v820_v9, %s3073_s27 }
 0x724   :  { %v653_v12 = vpop.permute.xlu0 %652 }
 0x725   :  { %v3379_v13 = vadd.f32 %v653_v12, %v645_v11 }
 0x727   :  { %2964 = vtanh.f32 %v3379_v13 }
 0x72e   :  { %v823_v15 = vpop.permute.xlu1 %822 }
 0x72f   :  { %v3383_v16 = vadd.f32 %v823_v15, %v815_v14 }
 0x731   :  { %2966 = vtanh.f32 %v3383_v16 }
 0x734   :  { %v2965_v17 = vpop.eup %2964 }
 0x735   :  { %658 = vrot.lane.b32.xlu0 %v2965_v17, %s3072_s26 }
 0x73e   :  { %v2967_v18 = vpop.eup %2966 }
 0x73f   :  { %828 = vrot.lane.b32.xlu1 %v2967_v18, %s3072_s26  ;;  %v174_v18 = vadd.f32 %v3186_v10, %v3309_v47 }
 0x7a7   :  { %v659_v20 = vpop.permute.xlu0 %658 }
 0x7a8   :  { %v661_v19 = vmul.f32 %v2961_v63, %v659_v20 }
 0x7aa   :  { %833 = vrot.lane.b32.xlu0 %v661_v19, %s3073_s27 }
 0x7b1   :  { %v829_v21 = vpop.permute.xlu1 %828 }
 0x7b2   :  { %v831_v23 = vmul.f32 %v2963_v5, %v829_v21 }
 0x7b4   :  { %933 = vrot.lane.b32.xlu1 %v831_v23, %s3073_s27 }
 0x81c   :  { %v834_v22 = vpop.permute.xlu0 %833 }
 0x81d   :  { %2735 = vmatmul.mubr.msk.f32.vlgmr.msra.gmra.mxu1 %vm192_vm2, %v834_v22 }
 0x81e   :  { %2749 = vmatpush3.msra.mxu1 %v3264_v39  ;;  %2756 = vmatprep.mubr.msk.f32.mxu1 %vm3071_vm0, %v3070_v0 }
 0x81f   :  { %2750 = vmatprep.subr.mxu1 %v3070_v0 }
 0x820   :  { %2751 = vmatpush3.msra.mxu1 %v3270_v41 }
 0x821   :  { %2752 = vmatprep.subr.mxu1 %v3070_v0 }
 0x822   :  { %2753 = vmatpush3.msra.mxu1 %v3279_v42 }
 0x823   :  { %2754 = vmatprep.subr.mxu1 %v3070_v0 }
 0x824   :  { %2755 = vmatpush3.msra.mxu1 %v3286_v43 }
 0x825   :  { %2757 = vmatmul.mubr.msk.f32.vlgmr.msra.gmra.mxu1 %vm192_vm2, %v834_v22  ;;  %2770 = vmatprep.subr.mxu1 %v3070_v0 }
 0x826   :  { %v934_v24 = vpop.permute.xlu1 %933  ;;  %2771 = vmatpush3.msra.mxu1 %v3203_v28  ;;  %2778 = vmatprep.mubr.msk.f32.mxu1 %vm3071_vm0, %v3070_v0 }
 0x827   :  { %2746 = vmatmul.mubr.msk.f32.vlgmr.msra.gmra.mxu0 %vm192_vm2, %v934_v24  ;;  %2772 = vmatprep.subr.mxu1 %v3070_v0 }
 0x828   :  { %2760 = vmatpush3.msra.mxu0 %v3131_v2  ;;  %2767 = vmatprep.mubr.msk.f32.mxu0 %vm3071_vm0, %v3070_v0 }
 0x829   :  { %2761 = vmatprep.subr.mxu0 %v3070_v0  ;;  %2773 = vmatpush3.msra.mxu1 %v3209_v29 }
 0x82a   :  { %2762 = vmatpush3.msra.mxu0 %v3142_v4  ;;  %2774 = vmatprep.subr.mxu1 %v3070_v0 }
 0x82b   :  { %2763 = vmatprep.subr.mxu0 %v3070_v0  ;;  %2775 = vmatpush3.msra.mxu1 %v3228_v33 }
 0x82c   :  { %2764 = vmatpush3.msra.mxu0 %v3155_v7  ;;  %2776 = vmatprep.subr.mxu1 %v3070_v0 }
 0x82d   :  { %2765 = vmatprep.subr.mxu0 %v3070_v0  ;;  %2777 = vmatpush3.msra.mxu1 %v3243_v36 }
 0x82e   :  { %2766 = vmatpush3.msra.mxu0 %v3163_v8  ;;  %2792 = vmatprep.subr.mxu1 %v3070_v0 }
 0x82f   :  { %2781 = vmatprep.subr.mxu0 %v3070_v0 }
 0x8dd   :  { %v903_v27 = vpop.f32.mrf.mxu1 }
 0x8de   :  { %v907_v25 = vadd.f32 %v903_v27, %v169_v26 }
 0x8df   :  { %v2736_v30 = vpop.f32.mrf.mxu1 }
 0x8e0   :  { %2968 = vtanh.f32 %v907_v25  ;;  %v2469_v51 = vmul.f32 -1.442695, %v907_v25 }
 0x8e5   :  { %v1073_v31 = vpop.f32.mrf.mxu1 }
 0x8e6   :  { %v1074_v32 = vadd.f32 %v3320_v56, %v1073_v31 }
 0x8e7   :  { %v1003_v34 = vpop.f32.mrf.mxu0  ;;  %v2758_v35 = vpop.f32.mrf.mxu1 }
 0x8e8   :  { %v1077_v37 = vadd.f32 %v1074_v32, %v1003_v34 }
 0x8e9   :  { %v2747_v38 = vpop.f32.mrf.mxu0 }
 0x8ea   :  { %2970 = vtanh.f32 %v1077_v37  ;;  %v2472_v44 = vmul.f32 -1.442695, %v1077_v37 }
 0x8eb   :  { %2972 = vpow2.f32 %v2469_v51 }
 0x8ec   :  { %2974 = vpow2.f32 %v2472_v44 }
 0x8ed   :  { %v2969_v40 = vpop.eup %2968 }
 0x8ee   :  { %917 = vrot.lane.b32.xlu0 %v2969_v40, %s3072_s26 }
 0x8f7   :  { %v2971_v50 = vpop.eup %2970 }
 0x8f8   :  { %1087 = vrot.lane.b32.xlu1 %v2971_v50, %s3072_s26  ;;  %v2973_v52 = vpop.eup %2972 }
 0x8f9   :  { %v911_v53 = vadd.f32 1.0, %v2973_v52  ;;  %v2975_v54 = vpop.eup %2974 }
 0x8fa   :  { %v1081_v55 = vadd.f32 1.0, %v2975_v54 }
 0x8fb   :  { %2976 = vrcp.f32 %v911_v53 }
 0x8fc   :  { %2978 = vrcp.f32 %v1081_v55 }
 0x908   :  { %v2977_v57 = vpop.eup %2976 }
 0x909   :  { %v2979_v59 = vpop.eup %2978  ;;  %v915_v62 = vmul.f32 %v2977_v57, %v3379_v13 }
 0x90a   :  { %v1085_v3 = vmul.f32 %v2979_v59, %v3383_v16 }
 0x960   :  { %v918_v58 = vpop.permute.xlu0 %917 }
 0x961   :  { %v920_v45 = vmul.f32 %v2977_v57, %v918_v58 }
 0x963   :  { %922 = vrot.lane.b32.xlu0 %v920_v45, %s3073_s27 }
 0x96a   :  { %v1088_v60 = vpop.permute.xlu1 %1087 }
 0x96b   :  { %v1090_v61 = vmul.f32 %v2979_v59, %v1088_v60 }
 0x96d   :  { %1092 = vrot.lane.b32.xlu1 %v1090_v61, %s3073_s27 }
 0x9d5   :  { %v923_v63 = vpop.permute.xlu0 %922 }
 0x9d6   :  { %v3431_v1 = vadd.f32 %v923_v63, %v915_v62 }
 0x9d8   :  { %2980 = vtanh.f32 %v3431_v1 }
 0x9df   :  { %v1093_v5 = vpop.permute.xlu1 %1092 }
 0x9e0   :  { %v3435_v6 = vadd.f32 %v1093_v5, %v1085_v3 }
 0x9e2   :  { %2982 = vtanh.f32 %v3435_v6 }
 0x9e5   :  { %v2981_v9 = vpop.eup %2980 }
 0x9e6   :  { %928 = vrot.lane.b32.xlu0 %v2981_v9, %s3072_s26 }
 0x9ef   :  { %v2983_v11 = vpop.eup %2982 }
 0x9f0   :  { %1098 = vrot.lane.b32.xlu1 %v2983_v11, %s3072_s26 }
 0xa58   :  { %v929_v12 = vpop.permute.xlu0 %928 }
 0xa59   :  { %v931_v13 = vmul.f32 %v2977_v57, %v929_v12 }
 0xa5b   :  { %1103 = vrot.lane.b32.xlu0 %v931_v13, %s3073_s27 }
 0xa62   :  { %v1099_v14 = vpop.permute.xlu1 %1098 }
 0xa63   :  { %v1101_v15 = vmul.f32 %v2979_v59, %v1099_v14 }
 0xa65   :  { %1203 = vrot.lane.b32.xlu1 %v1101_v15, %s3073_s27 }
 0xacd   :  { %v1104_v16 = vpop.permute.xlu0 %1103 }
 0xace   :  { %2768 = vmatmul.mubr.msk.f32.vlgmr.msra.gmra.mxu0 %vm192_vm2, %v1104_v16 }
 0xacf   :  { %2782 = vmatpush3.msra.mxu0 %v3264_v39  ;;  %2789 = vmatprep.mubr.msk.f32.mxu0 %vm3071_vm0, %v3070_v0 }
 0xad0   :  { %2783 = vmatprep.subr.mxu0 %v3070_v0 }
 0xad1   :  { %2784 = vmatpush3.msra.mxu0 %v3270_v41 }
 0xad2   :  { %2785 = vmatprep.subr.mxu0 %v3070_v0 }
 0xad3   :  { %2786 = vmatpush3.msra.mxu0 %v3279_v42 }
 0xad4   :  { %2787 = vmatprep.subr.mxu0 %v3070_v0 }
 0xad5   :  { %2788 = vmatpush3.msra.mxu0 %v3286_v43 }
 0xad6   :  { %2790 = vmatmul.mubr.msk.f32.vlgmr.msra.gmra.mxu0 %vm192_vm2, %v1104_v16  ;;  %2803 = vmatprep.subr.mxu0 %v3070_v0 }
 0xad7   :  { %v1204_v17 = vpop.permute.xlu1 %1203  ;;  %2804 = vmatpush3.msra.mxu0 %v3203_v28  ;;  %2811 = vmatprep.mubr.msk.f32.mxu0 %vm3071_vm0, %v3070_v0 }
 0xad8   :  { %2779 = vmatmul.mubr.msk.f32.vlgmr.msra.gmra.mxu1 %vm192_vm2, %v1204_v17  ;;  %2805 = vmatprep.subr.mxu0 %v3070_v0 }
 0xad9   :  { %2793 = vmatpush3.msra.mxu1 %v3131_v2  ;;  %2800 = vmatprep.mubr.msk.f32.mxu1 %vm3071_vm0, %v3070_v0 }
 0xada   :  { %2794 = vmatprep.subr.mxu1 %v3070_v0  ;;  %2806 = vmatpush3.msra.mxu0 %v3209_v29 }
 0xadb   :  { %2795 = vmatpush3.msra.mxu1 %v3142_v4  ;;  %2807 = vmatprep.subr.mxu0 %v3070_v0 }
 0xadc   :  { %2796 = vmatprep.subr.mxu1 %v3070_v0  ;;  %2808 = vmatpush3.msra.mxu0 %v3228_v33 }
 0xadd   :  { %2797 = vmatpush3.msra.mxu1 %v3155_v7  ;;  %2809 = vmatprep.subr.mxu0 %v3070_v0 }
 0xade   :  { %2798 = vmatprep.subr.mxu1 %v3070_v0  ;;  %2810 = vmatpush3.msra.mxu0 %v3243_v36 }
 0xadf   :  { %2799 = vmatpush3.msra.mxu1 %v3163_v8  ;;  %2825 = vmatprep.subr.mxu0 %v3070_v0 }
 0xae0   :  { %2814 = vmatprep.subr.mxu1 %v3070_v0 }
 0xb8e   :  { %v1173_v20 = vpop.f32.mrf.mxu0 }
 0xb8f   :  { %v1177_v19 = vadd.f32 %v1173_v20, %v174_v18 }
 0xb90   :  { %v2769_v21 = vpop.f32.mrf.mxu0 }
 0xb91   :  { %2984 = vtanh.f32 %v1177_v19  ;;  %v2474_v32 = vmul.f32 -1.442695, %v1177_v19 }
 0xb96   :  { %v1343_v23 = vpop.f32.mrf.mxu0 }
 0xb97   :  { %v1344_v22 = vadd.f32 %v3320_v56, %v1343_v23 }
 0xb98   :  { %v1273_v24 = vpop.f32.mrf.mxu1  ;;  %v2791_v26 = vpop.f32.mrf.mxu0 }
 0xb99   :  { %v1347_v27 = vadd.f32 %v1344_v22, %v1273_v24 }
 0xb9a   :  { %v2780_v25 = vpop.f32.mrf.mxu1 }
 0xb9b   :  { %2986 = vtanh.f32 %v1347_v27  ;;  %v2477_v47 = vmul.f32 -1.442695, %v1347_v27 }
 0xb9c   :  { %2988 = vpow2.f32 %v2474_v32 }
 0xb9d   :  { %2990 = vpow2.f32 %v2477_v47 }
 0xb9e   :  { %v2985_v30 = vpop.eup %2984 }
 0xb9f   :  { %1187 = vrot.lane.b32.xlu0 %v2985_v30, %s3072_s26 }
 0xba8   :  { %v2987_v31 = vpop.eup %2986 }
 0xba9   :  { %1357 = vrot.lane.b32.xlu1 %v2987_v31, %s3072_s26  ;;  %v2989_v34 = vpop.eup %2988 }
 0xbaa   :  { %v1181_v35 = vadd.f32 1.0, %v2989_v34  ;;  %v2991_v37 = vpop.eup %2990 }
 0xbab   :  { %v1351_v38 = vadd.f32 1.0, %v2991_v37 }
 0xbac   :  { %2992 = vrcp.f32 %v1181_v35 }
 0xbad   :  { %2994 = vrcp.f32 %v1351_v38 }
 0xbb9   :  { %v2993_v40 = vpop.eup %2992 }
 0xbba   :  { %v2995_v44 = vpop.eup %2994  ;;  %v1185_v54 = vmul.f32 %v2993_v40, %v3431_v1 }
 0xbbb   :  { %v1355_v58 = vmul.f32 %v2995_v44, %v3435_v6 }
 0xc11   :  { %v1188_v50 = vpop.permute.xlu0 %1187 }
 0xc12   :  { %v1190_v51 = vmul.f32 %v2993_v40, %v1188_v50 }
 0xc14   :  { %1192 = vrot.lane.b32.xlu0 %v1190_v51, %s3073_s27 }
 0xc1b   :  { %v1358_v52 = vpop.permute.xlu1 %1357 }
 0xc1c   :  { %v1360_v53 = vmul.f32 %v2995_v44, %v1358_v52 }
 0xc1e   :  { %1362 = vrot.lane.b32.xlu1 %v1360_v53, %s3073_s27 }
 0xc86   :  { %v1193_v55 = vpop.permute.xlu0 %1192 }
 0xc87   :  { %v3483_v57 = vadd.f32 %v1193_v55, %v1185_v54  ;;  %v3056_v54 = vld [vmem:[%s3706_s2 + $0x18] sm:$0xff]  ;;  %v3058_v55 = vld [vmem:[%s3706_s2 + $0x8] sm:$0xff] }
 0xc89   :  { %2996 = vtanh.f32 %v3483_v57 }
 0xc90   :  { %v1363_v45 = vpop.permute.xlu1 %1362 }
 0xc91   :  { %v3487_v59 = vadd.f32 %v1363_v45, %v1355_v58 }
 0xc93   :  { %2998 = vtanh.f32 %v3487_v59 }
 0xc96   :  { %v2997_v60 = vpop.eup %2996 }
 0xc97   :  { %1198 = vrot.lane.b32.xlu0 %v2997_v60, %s3072_s26 }
 0xca0   :  { %v2999_v61 = vpop.eup %2998 }
 0xca1   :  { %1368 = vrot.lane.b32.xlu1 %v2999_v61, %s3072_s26 }
 0xd09   :  { %v1199_v62 = vpop.permute.xlu0 %1198 }
 0xd0a   :  { %v1201_v63 = vmul.f32 %v2993_v40, %v1199_v62 }
 0xd0c   :  { %1373 = vrot.lane.b32.xlu0 %v1201_v63, %s3073_s27 }
 0xd13   :  { %v1369_v1 = vpop.permute.xlu1 %1368 }
 0xd14   :  { %v1371_v3 = vmul.f32 %v2995_v44, %v1369_v1 }
 0xd16   :  { %1473 = vrot.lane.b32.xlu1 %v1371_v3, %s3073_s27 }
 0xd7e   :  { %v1374_v5 = vpop.permute.xlu0 %1373 }
 0xd7f   :  { %2801 = vmatmul.mubr.msk.f32.vlgmr.msra.gmra.mxu1 %vm192_vm2, %v1374_v5 }
 0xd80   :  { %2815 = vmatpush3.msra.mxu1 %v3264_v39  ;;  %2822 = vmatprep.mubr.msk.f32.mxu1 %vm3071_vm0, %v3070_v0 }
 0xd81   :  { %2816 = vmatprep.subr.mxu1 %v3070_v0 }
 0xd82   :  { %2817 = vmatpush3.msra.mxu1 %v3270_v41 }
 0xd83   :  { %2818 = vmatprep.subr.mxu1 %v3070_v0 }
 0xd84   :  { %2819 = vmatpush3.msra.mxu1 %v3279_v42 }
 0xd85   :  { %2820 = vmatprep.subr.mxu1 %v3070_v0 }
 0xd86   :  { %2821 = vmatpush3.msra.mxu1 %v3286_v43 }
 0xd87   :  { %2823 = vmatmul.mubr.msk.f32.vlgmr.msra.gmra.mxu1 %vm192_vm2, %v1374_v5  ;;  %2836 = vmatprep.subr.mxu1 %v3070_v0 }
 0xd88   :  { %v1474_v6 = vpop.permute.xlu1 %1473  ;;  %2837 = vmatpush3.msra.mxu1 %v3203_v28  ;;  %2844 = vmatprep.mubr.msk.f32.mxu1 %vm3071_vm0, %v3070_v0 }
 0xd89   :  { %2812 = vmatmul.mubr.msk.f32.vlgmr.msra.gmra.mxu0 %vm192_vm2, %v1474_v6  ;;  %2838 = vmatprep.subr.mxu1 %v3070_v0 }
 0xd8a   :  { %2826 = vmatpush3.msra.mxu0 %v3131_v2  ;;  %2833 = vmatprep.mubr.msk.f32.mxu0 %vm3071_vm0, %v3070_v0  ;;  %v179_v2 = vadd.f32 %v3307_v46, %v3186_v10 }
 0xd8b   :  { %2827 = vmatprep.subr.mxu0 %v3070_v0  ;;  %2839 = vmatpush3.msra.mxu1 %v3209_v29 }
 0xd8c   :  { %2828 = vmatpush3.msra.mxu0 %v3142_v4  ;;  %2840 = vmatprep.subr.mxu1 %v3070_v0 }
 0xd8d   :  { %2829 = vmatprep.subr.mxu0 %v3070_v0  ;;  %2841 = vmatpush3.msra.mxu1 %v3228_v33 }
 0xd8e   :  { %2830 = vmatpush3.msra.mxu0 %v3155_v7  ;;  %2842 = vmatprep.subr.mxu1 %v3070_v0 }
 0xd8f   :  { %2831 = vmatprep.subr.mxu0 %v3070_v0  ;;  %2843 = vmatpush3.msra.mxu1 %v3243_v36 }
 0xd90   :  { %2832 = vmatpush3.msra.mxu0 %v3163_v8  ;;  %2858 = vmatprep.subr.mxu1 %v3070_v0 }
 0xd91   :  { %2847 = vmatprep.subr.mxu0 %v3070_v0 }
 0xe3f   :  { %v1443_v4 = vpop.f32.mrf.mxu1 }
 0xe40   :  { %v1447_v9 = vadd.f32 %v1443_v4, %v179_v2 }
 0xe41   :  { %v2802_v11 = vpop.f32.mrf.mxu1 }
 0xe42   :  { %3000 = vtanh.f32 %v1447_v9  ;;  %v2479_v18 = vmul.f32 -1.442695, %v1447_v9 }
 0xe47   :  { %v1613_v7 = vpop.f32.mrf.mxu1 }
 0xe48   :  { %v1614_v12 = vadd.f32 %v3320_v56, %v1613_v7 }
 0xe49   :  { %v1543_v13 = vpop.f32.mrf.mxu0  ;;  %v2824_v14 = vpop.f32.mrf.mxu1 }
 0xe4a   :  { %v1617_v15 = vadd.f32 %v1614_v12, %v1543_v13 }
 0xe4b   :  { %v2813_v16 = vpop.f32.mrf.mxu0 }
 0xe4c   :  { %3002 = vtanh.f32 %v1617_v15  ;;  %v2482_v10 = vmul.f32 -1.442695, %v1617_v15 }
 0xe4d   :  { %3004 = vpow2.f32 %v2479_v18 }
 0xe4e   :  { %3006 = vpow2.f32 %v2482_v10 }
 0xe4f   :  { %v3001_v8 = vpop.eup %3000 }
 0xe50   :  { %1457 = vrot.lane.b32.xlu0 %v3001_v8, %s3072_s26 }
 0xe59   :  { %v3003_v17 = vpop.eup %3002 }
 0xe5a   :  { %1627 = vrot.lane.b32.xlu1 %v3003_v17, %s3072_s26  ;;  %v3005_v46 = vpop.eup %3004 }
 0xe5b   :  { %v1451_v20 = vadd.f32 1.0, %v3005_v46  ;;  %v3007_v19 = vpop.eup %3006 }
 0xe5c   :  { %v1621_v21 = vadd.f32 1.0, %v3007_v19 }
 0xe5d   :  { %3008 = vrcp.f32 %v1451_v20 }
 0xe5e   :  { %3010 = vrcp.f32 %v1621_v21 }
 0xe6a   :  { %v3009_v23 = vpop.eup %3008 }
 0xe6b   :  { %v3011_v26 = vpop.eup %3010  ;;  %v1455_v30 = vmul.f32 %v3009_v23, %v3483_v57 }
 0xe6c   :  { %v1625_v47 = vmul.f32 %v3011_v26, %v3487_v59 }
 0xec2   :  { %v1458_v22 = vpop.permute.xlu0 %1457 }
 0xec3   :  { %v1460_v24 = vmul.f32 %v3009_v23, %v1458_v22 }
 0xec5   :  { %1462 = vrot.lane.b32.xlu0 %v1460_v24, %s3073_s27 }
 0xecc   :  { %v1628_v27 = vpop.permute.xlu1 %1627 }
 0xecd   :  { %v1630_v25 = vmul.f32 %v3011_v26, %v1628_v27 }
 0xecf   :  { %1632 = vrot.lane.b32.xlu1 %v1630_v25, %s3073_s27  ;;  %v3061_v25 = vld [vmem:[%s3710_s4 + $0x18] sm:$0xff] }
 0xf37   :  { %v1463_v31 = vpop.permute.xlu0 %1462 }
 0xf38   :  { %v3535_v32 = vadd.f32 %v1463_v31, %v1455_v30  ;;  %v3065_v30 = vld [vmem:[%s3709_s5 + $0x10] sm:$0xff]  ;;  %v3066_v31 = vld [vmem:[%s3710_s4] sm:$0xff] }
 0xf3a   :  { %3012 = vtanh.f32 %v3535_v32 }
 0xf41   :  { %v1633_v34 = vpop.permute.xlu1 %1632 }
 0xf42   :  { %v3539_v35 = vadd.f32 %v1633_v34, %v1625_v47  ;;  %v3068_v47 = vld [vmem:[%s3709_s5] sm:$0xff] }
 0xf44   :  { %3014 = vtanh.f32 %v3539_v35 }
 0xf47   :  { %v3013_v37 = vpop.eup %3012 }
 0xf48   :  { %1468 = vrot.lane.b32.xlu0 %v3013_v37, %s3072_s26 }
 0xf51   :  { %v3015_v38 = vpop.eup %3014 }
 0xf52   :  { %1638 = vrot.lane.b32.xlu1 %v3015_v38, %s3072_s26 }
 0xfba   :  { %v1469_v40 = vpop.permute.xlu0 %1468 }
 0xfbb   :  { %v1471_v50 = vmul.f32 %v3009_v23, %v1469_v40 }
 0xfbd   :  { %1643 = vrot.lane.b32.xlu0 %v1471_v50, %s3073_s27 }
 0xfc4   :  { %v1639_v51 = vpop.permute.xlu1 %1638 }
 0xfc5   :  { %v1641_v44 = vmul.f32 %v3011_v26, %v1639_v51 }
 0xfc7   :  { %1743 = vrot.lane.b32.xlu1 %v1641_v44, %s3073_s27 }
0x102f   :  { %v1644_v52 = vpop.permute.xlu0 %1643 }
0x1030   :  { %2834 = vmatmul.mubr.msk.f32.vlgmr.msra.gmra.mxu0 %vm192_vm2, %v1644_v52 }
0x1031   :  { %2848 = vmatpush3.msra.mxu0 %v3264_v39  ;;  %2855 = vmatprep.mubr.msk.f32.mxu0 %vm3071_vm0, %v3070_v0 }
0x1032   :  { %2849 = vmatprep.subr.mxu0 %v3070_v0 }
0x1033   :  { %2850 = vmatpush3.msra.mxu0 %v3270_v41 }
0x1034   :  { %2851 = vmatprep.subr.mxu0 %v3070_v0 }
0x1035   :  { %2852 = vmatpush3.msra.mxu0 %v3279_v42 }
0x1036   :  { %2853 = vmatprep.subr.mxu0 %v3070_v0 }
0x1037   :  { %2854 = vmatpush3.msra.mxu0 %v3286_v43 }
0x1038   :  { %2856 = vmatmul.mubr.msk.f32.vlgmr.msra.gmra.mxu0 %vm192_vm2, %v1644_v52  ;;  %2869 = vmatprep.subr.mxu0 %v3070_v0 }
0x1039   :  { %v1744_v53 = vpop.permute.xlu1 %1743  ;;  %2870 = vmatpush3.msra.mxu0 %v3203_v28  ;;  %2877 = vmatprep.mubr.msk.f32.mxu0 %vm3071_vm0, %v3070_v0  ;;  %v3057_v28 = vld [vmem:[%s3706_s2 + $0x10] sm:$0xff] }
0x103a   :  { %2845 = vmatmul.mubr.msk.f32.vlgmr.msra.gmra.mxu1 %vm192_vm2, %v1744_v53  ;;  %2871 = vmatprep.subr.mxu0 %v3070_v0 }
0x103b   :  { %2859 = vmatpush3.msra.mxu1 %v3056_v54  ;;  %2866 = vmatprep.mubr.msk.f32.mxu1 %vm3071_vm0, %v3070_v0 }
0x103c   :  { %2860 = vmatprep.subr.mxu1 %v3070_v0  ;;  %2872 = vmatpush3.msra.mxu0 %v3209_v29  ;;  %v3059_v29 = vld [vmem:[%s3706_s2] sm:$0xff] }
0x103d   :  { %2861 = vmatpush3.msra.mxu1 %v3057_v28  ;;  %2873 = vmatprep.subr.mxu0 %v3070_v0 }
0x103e   :  { %2862 = vmatprep.subr.mxu1 %v3070_v0  ;;  %2874 = vmatpush3.msra.mxu0 %v3228_v33  ;;  %v3590_v33 = vld [vmem:[%s3708_s3] ss:$0 sm:$0xff] }
0x103f   :  { %2863 = vmatpush3.msra.mxu1 %v3058_v55  ;;  %2875 = vmatprep.subr.mxu0 %v3070_v0  ;;  %v184_v57 = vadd.f32 %v3590_v33, %v3313_v49  ;;  %v189_v34 = vadd.f32 %v3590_v33, %v3311_v48 }
0x1040   :  { %2864 = vmatprep.subr.mxu1 %v3070_v0  ;;  %2876 = vmatpush3.msra.mxu0 %v3243_v36 }
0x1041   :  { %2865 = vmatpush3.msra.mxu1 %v3059_v29  ;;  %2891 = vmatprep.subr.mxu0 %v3070_v0 }
0x1042   :  { %2880 = vmatprep.subr.mxu1 %v3070_v0 }
0x10f0   :  { %v1713_v58 = vpop.f32.mrf.mxu0 }
0x10f1   :  { %v1717_v45 = vadd.f32 %v1713_v58, %v184_v57 }
0x10f2   :  { %v2835_v36 = vpop.f32.mrf.mxu0 }
0x10f3   :  { %3016 = vtanh.f32 %v1717_v45  ;;  %v2484_v6 = vmul.f32 -1.442695, %v1717_v45 }
0x10f8   :  { %v1883_v59 = vpop.f32.mrf.mxu0 }
0x10f9   :  { %v1884_v60 = vadd.f32 %v3320_v56, %v1883_v59 }
0x10fa   :  { %v1813_v61 = vpop.f32.mrf.mxu1  ;;  %v2857_v62 = vpop.f32.mrf.mxu0 }
0x10fb   :  { %v1887_v63 = vadd.f32 %v1884_v60, %v1813_v61 }
0x10fc   :  { %v2846_v1 = vpop.f32.mrf.mxu1 }
0x10fd   :  { %3018 = vtanh.f32 %v1887_v63  ;;  %v2487_v49 = vmul.f32 -1.442695, %v1887_v63 }
0x10fe   :  { %3020 = vpow2.f32 %v2484_v6 }
0x10ff   :  { %3022 = vpow2.f32 %v2487_v49 }
0x1100   :  { %v3017_v3 = vpop.eup %3016 }
0x1101   :  { %1727 = vrot.lane.b32.xlu0 %v3017_v3, %s3072_s26 }
0x110a   :  { %v3019_v5 = vpop.eup %3018 }
0x110b   :  { %1897 = vrot.lane.b32.xlu1 %v3019_v5, %s3072_s26  ;;  %v3021_v2 = vpop.eup %3020 }
0x110c   :  { %v1721_v4 = vadd.f32 1.0, %v3021_v2  ;;  %v3023_v9 = vpop.eup %3022 }
0x110d   :  { %v1891_v11 = vadd.f32 1.0, %v3023_v9 }
0x110e   :  { %3024 = vrcp.f32 %v1721_v4 }
0x110f   :  { %3026 = vrcp.f32 %v1891_v11 }
0x111b   :  { %v3025_v7 = vpop.eup %3024 }
0x111c   :  { %v3027_v14 = vpop.eup %3026  ;;  %v1725_v8 = vmul.f32 %v3025_v7, %v3535_v32  ;;  %v3067_v32 = vld [vmem:[%s3709_s5 + $0x8] sm:$0xff] }
0x111d   :  { %v1895_v10 = vmul.f32 %v3027_v14, %v3539_v35 }
0x1173   :  { %v1728_v12 = vpop.permute.xlu0 %1727 }
0x1174   :  { %v1730_v13 = vmul.f32 %v3025_v7, %v1728_v12 }
0x1176   :  { %1732 = vrot.lane.b32.xlu0 %v1730_v13, %s3073_s27 }
0x117d   :  { %v1898_v15 = vpop.permute.xlu1 %1897 }
0x117e   :  { %v1900_v16 = vmul.f32 %v3027_v14, %v1898_v15 }
0x1180   :  { %1902 = vrot.lane.b32.xlu1 %v1900_v16, %s3073_s27  ;;  %v3069_v16 = vld [vmem:[%s3711_s6] ss:$0 sm:$0xff] }
0x11e8   :  { %v1733_v17 = vpop.permute.xlu0 %1732 }
0x11e9   :  { %v3600_v18 = vadd.f32 %v1733_v17, %v1725_v8 }
0x11eb   :  { %3028 = vtanh.f32 %v3600_v18 }
0x11f2   :  { %v1903_v46 = vpop.permute.xlu1 %1902 }
0x11f3   :  { %v3604_v20 = vadd.f32 %v1903_v46, %v1895_v10 }
0x11f5   :  { %3030 = vtanh.f32 %v3604_v20 }
0x11f8   :  { %v3029_v19 = vpop.eup %3028 }
0x11f9   :  { %1738 = vrot.lane.b32.xlu0 %v3029_v19, %s3072_s26 }
0x1202   :  { %v3031_v21 = vpop.eup %3030 }
0x1203   :  { %1908 = vrot.lane.b32.xlu1 %v3031_v21, %s3072_s26 }
0x126b   :  { %v1739_v23 = vpop.permute.xlu0 %1738 }
0x126c   :  { %v1741_v22 = vmul.f32 %v3025_v7, %v1739_v23 }
0x126e   :  { %1913 = vrot.lane.b32.xlu0 %v1741_v22, %s3073_s27 }
0x1275   :  { %v1909_v24 = vpop.permute.xlu1 %1908 }
0x1276   :  { %v1911_v26 = vmul.f32 %v3027_v14, %v1909_v24 }
0x1278   :  { %2013 = vrot.lane.b32.xlu1 %v1911_v26, %s3073_s27 }
0x12e0   :  { %v1914_v27 = vpop.permute.xlu0 %1913 }
0x12e1   :  { %2867 = vmatmul.mubr.msk.f32.vlgmr.msra.gmra.mxu1 %vm192_vm2, %v1914_v27 }
0x12e2   :  { %2881 = vmatpush3.msra.mxu1 %v3264_v39  ;;  %2888 = vmatprep.mubr.msk.f32.mxu1 %vm3071_vm0, %v3070_v0 }
0x12e3   :  { %2882 = vmatprep.subr.mxu1 %v3070_v0 }
0x12e4   :  { %2883 = vmatpush3.msra.mxu1 %v3270_v41  ;;  %v3062_v41 = vld [vmem:[%s3710_s4 + $0x10] sm:$0xff] }
0x12e5   :  { %2884 = vmatprep.subr.mxu1 %v3070_v0 }
0x12e6   :  { %2885 = vmatpush3.msra.mxu1 %v3279_v42  ;;  %v3063_v42 = vld [vmem:[%s3709_s5 + $0x18] sm:$0xff] }
0x12e7   :  { %2886 = vmatprep.subr.mxu1 %v3070_v0 }
0x12e8   :  { %2887 = vmatpush3.msra.mxu1 %v3286_v43  ;;  %v3064_v43 = vld [vmem:[%s3710_s4 + $0x8] sm:$0xff] }
0x12e9   :  { %2889 = vmatmul.mubr.msk.f32.vlgmr.msra.gmra.mxu1 %vm192_vm2, %v1914_v27  ;;  %2902 = vmatprep.subr.mxu1 %v3070_v0 }
0x12ea   :  { %v2014_v39 = vpop.permute.xlu1 %2013  ;;  %2903 = vmatpush3.msra.mxu1 %v3061_v25  ;;  %2910 = vmatprep.mubr.msk.f32.mxu1 %vm3071_vm0, %v3070_v0  ;;  %v2360_v25 = vld [vmem:[%s3712_s7 + $0x18] sm:$0xff] }
0x12eb   :  { %2878 = vmatmul.mubr.msk.f32.vlgmr.msra.gmra.mxu0 %vm192_vm2, %v2014_v39  ;;  %2904 = vmatprep.subr.mxu1 %v3070_v0 }
0x12ec   :  { %2905 = vmatpush3.msra.mxu1 %v3062_v41  ;;  %2892 = vmatpush3.msra.mxu0 %v3063_v42  ;;  %v2359_v41 = vld [vmem:[%s3712_s7 + $0x10] sm:$0xff]  ;;  %v2358_v42 = vld [vmem:[%s3712_s7 + $0x8] sm:$0xff] }
0x12ed   :  { %2906 = vmatprep.subr.mxu1 %v3070_v0  ;;  %2893 = vmatprep.subr.mxu0 %v3070_v0 }
0x12ee   :  { %2907 = vmatpush3.msra.mxu1 %v3064_v43  ;;  %2894 = vmatpush3.msra.mxu0 %v3065_v30  ;;  %v2357_v43 = vld [vmem:[%s3712_s7] sm:$0xff] }
0x12ef   :  { %2908 = vmatprep.subr.mxu1 %v3070_v0  ;;  %2895 = vmatprep.subr.mxu0 %v3070_v0 }
0x12f0   :  { %2909 = vmatpush3.msra.mxu1 %v3066_v31  ;;  %2896 = vmatpush3.msra.mxu0 %v3067_v32 }
0x12f1   :  { %2897 = vmatprep.subr.mxu0 %v3070_v0  ;;  %2899 = vmatprep.mubr.msk.f32.mxu0 %vm3071_vm0, %v3070_v0 }
0x12f2   :  { %2898 = vmatpush3.msra.mxu0 %v3068_v47 }
0x12f3   :  { %2913 = vmatprep.subr.mxu0 %v3070_v0 }
0x13a1   :  { %v1983_v35 = vpop.f32.mrf.mxu1 }
0x13a2   :  { %v1987_v37 = vadd.f32 %v1983_v35, %v189_v34  ;;  %v2496_v34 = vld [vmem:[%s3713_s8] ss:$0 sm:$0xff] }
0x13a3   :  { %v2868_v38 = vpop.f32.mrf.mxu1 }
0x13a4   :  { %3032 = vtanh.f32 %v1987_v37  ;;  %v2489_v55 = vmul.f32 -1.442695, %v1987_v37 }
0x13a9   :  { %v2153_v40 = vpop.f32.mrf.mxu1 }
0x13aa   :  { %v2154_v50 = vadd.f32 %v3320_v56, %v2153_v40 }
0x13ab   :  { %v2083_v51 = vpop.f32.mrf.mxu0  ;;  %v2890_v44 = vpop.f32.mrf.mxu1 }
0x13ac   :  { %v2157_v52 = vadd.f32 %v2154_v50, %v2083_v51 }
0x13ad   :  { %v2879_v53 = vpop.f32.mrf.mxu0 }
0x13ae   :  { %3034 = vtanh.f32 %v2157_v52  ;;  %v2492_v48 = vmul.f32 -1.442695, %v2157_v52 }
0x13af   :  { %3036 = vpow2.f32 %v2489_v55 }
0x13b0   :  { %3038 = vpow2.f32 %v2492_v48 }
0x13b1   :  { %v3033_v54 = vpop.eup %3032 }
0x13b2   :  { %1997 = vrot.lane.b32.xlu0 %v3033_v54, %s3072_s26 }
0x13bb   :  { %v3035_v28 = vpop.eup %3034 }
0x13bc   :  { %2167 = vrot.lane.b32.xlu1 %v3035_v28, %s3072_s26  ;;  %v3037_v29 = vpop.eup %3036 }
0x13bd   :  { %v1991_v33 = vadd.f32 1.0, %v3037_v29  ;;  %v3039_v57 = vpop.eup %3038 }
0x13be   :  { %v2161_v56 = vadd.f32 1.0, %v3039_v57 }
0x13bf   :  { %3040 = vrcp.f32 %v1991_v33 }
0x13c0   :  { %3042 = vrcp.f32 %v2161_v56 }
0x13cc   :  { %v3041_v58 = vpop.eup %3040 }
0x13cd   :  { %v3043_v59 = vpop.eup %3042  ;;  %v1995_v62 = vmul.f32 %v3041_v58, %v3600_v18 }
0x13ce   :  { %v2165_v3 = vmul.f32 %v3043_v59, %v3604_v20 }
0x1424   :  { %v1998_v45 = vpop.permute.xlu0 %1997 }
0x1425   :  { %v2000_v36 = vmul.f32 %v3041_v58, %v1998_v45 }
0x1427   :  { %2002 = vrot.lane.b32.xlu0 %v2000_v36, %s3073_s27 }
0x142e   :  { %v2168_v60 = vpop.permute.xlu1 %2167 }
0x142f   :  { %v2170_v61 = vmul.f32 %v3043_v59, %v2168_v60 }
0x1431   :  { %2172 = vrot.lane.b32.xlu1 %v2170_v61, %s3073_s27 }
0x1499   :  { %v2003_v63 = vpop.permute.xlu0 %2002 }
0x149a   :  { %v2005_v1 = vadd.f32 %v2003_v63, %v1995_v62 }
0x149c   :  { %3044 = vtanh.f32 %v2005_v1 }
0x14a3   :  { %v2173_v5 = vpop.permute.xlu1 %2172 }
0x14a4   :  { %v2175_v6 = vadd.f32 %v2173_v5, %v2165_v3 }
0x14a6   :  { %3046 = vtanh.f32 %v2175_v6 }
0x14a9   :  { %v3045_v49 = vpop.eup %3044 }
0x14aa   :  { %2008 = vrot.lane.b32.xlu0 %v3045_v49, %s3072_s26 }
0x14b3   :  { %v3047_v2 = vpop.eup %3046 }
0x14b4   :  { %2178 = vrot.lane.b32.xlu1 %v3047_v2, %s3072_s26 }
0x151c   :  { %v2009_v4 = vpop.permute.xlu0 %2008 }
0x151d   :  { %v2011_v9 = vmul.f32 %v3041_v58, %v2009_v4 }
0x151f   :  { %2258 = vrot.lane.b32.xlu0 %v2011_v9, %s3073_s27 }
0x1526   :  { %v2179_v11 = vpop.permute.xlu1 %2178 }
0x1527   :  { %v2181_v7 = vmul.f32 %v3043_v59, %v2179_v11 }
0x1529   :  { %2183 = vrot.lane.b32.xlu1 %v2181_v7, %s3073_s27 }
0x1591   :  { %v2259_v12 = vpop.permute.xlu0 %2258 }
0x1592   :  { %2911 = vmatmul.mubr.msk.f32.vlgmr.msra.gmra.mxu1 %vm192_vm2, %v2259_v12 }
0x159b   :  { %v2184_v13 = vpop.permute.xlu1 %2183 }
0x159c   :  { %2900 = vmatmul.mubr.msk.f32.vlgmr.msra.gmra.mxu0 %vm192_vm2, %v2184_v13 }
0x159d   :  { %2921 = vmatprep.mubr.msk.f32.mxu0 %vm3071_vm0, %v3070_v0  ;;  %2914 = vmatpush3.msra.mxu0 %v2360_v25 }
0x159e   :  { %2915 = vmatprep.subr.mxu0 %v3070_v0 }
0x159f   :  { %2916 = vmatpush3.msra.mxu0 %v2359_v41 }
0x15a0   :  { %2917 = vmatprep.subr.mxu0 %v3070_v0 }
0x15a1   :  { %2918 = vmatpush3.msra.mxu0 %v2358_v42 }
0x15a2   :  { %2919 = vmatprep.subr.mxu0 %v3070_v0 }
0x15a3   :  { %2920 = vmatpush3.msra.mxu0 %v2357_v43 }
0x1652   :  { %v2328_v14 = vpop.f32.mrf.mxu1 }
0x1653   :  { %v2329_v8 = vadd.f32 %v3069_v16, %v2328_v14 }
0x1654   :  { %v2912_v15 = vpop.f32.mrf.mxu1 }
0x165c   :  { %v2253_v17 = vpop.f32.mrf.mxu0 }
0x165d   :  { %v2332_v18 = vadd.f32 %v2329_v8, %v2253_v17 }
0x165e   :  { %v2901_v10 = vpop.f32.mrf.mxu0 }
0x165f   :  { %3048 = vtanh.f32 %v2332_v18  ;;  %v2495_v20 = vmul.f32 -1.442695, %v2332_v18 }
0x1661   :  { %3050 = vpow2.f32 %v2495_v20 }
0x166c   :  { %v3049_v46 = vpop.eup %3048 }
0x166d   :  { %2342 = vrot.lane.b32.xlu0 %v3049_v46, %s3072_s26 }
0x166e   :  { %v3051_v19 = vpop.eup %3050 }
0x166f   :  { %v2336_v21 = vadd.f32 1.0, %v3051_v19 }
0x1671   :  { %3052 = vrcp.f32 %v2336_v21 }
0x167e   :  { %v3053_v23 = vpop.eup %3052 }
0x167f   :  { %v2340_v26 = vmul.f32 %v3053_v23, %v2175_v6 }
0x16df   :  { %v2343_v22 = vpop.permute.xlu0 %2342 }
0x16e0   :  { %v2345_v24 = vmul.f32 %v3053_v23, %v2343_v22 }
0x16e2   :  { %2347 = vrot.lane.b32.xlu1 %v2345_v24, %s3073_s27 }
0x1754   :  { %v2348_v27 = vpop.permute.xlu1 %2347 }
0x1755   :  { %v2350_v39 = vadd.f32 %v2348_v27, %v2340_v26 }
0x1757   :  { %3054 = vtanh.f32 %v2350_v39 }
0x1764   :  { %v3055_v30 = vpop.eup %3054 }
0x1765   :  { %2353 = vrot.lane.b32.xlu0 %v3055_v30, %s3072_s26 }
0x17d7   :  { %v2354_v31 = vpop.permute.xlu0 %2353 }
0x17d8   :  { %v2356_v32 = vmul.f32 %v3053_v23, %v2354_v31 }
0x17da   :  { %2369 = vrot.lane.b32.xlu1 %v2356_v32, %s3073_s27 }
0x184c   :  { %v2370_v47 = vpop.permute.xlu1 %2369 }
0x184d   :  { %2922 = vmatmul.mubr.msk.f32.vlgmr.msra.gmra.mxu0 %vm192_vm2, %v2370_v47 }
0x190d   :  { %v2439_v35 = vpop.f32.mrf.mxu0 }
0x190e   :  { %v2440_v37 = vadd.f32 %v2496_v34, %v2439_v35 }
0x190f   :  { %v2923_v38 = vpop.f32.mrf.mxu0 }
0x1910   :  { %2443 = vst [vmem:[%s3714_s9] sm:$0xff] %v2440_v37 }

</bundles_post_ra>
